<compile_context>
chip_gen: v7x
topology: tpu7x:2x2x1
jax: 0.10.0
libtpu: 0.0.40
codegen_flags: <defaults>
</compile_context>

<pallas_src>
import jax
import jax.numpy as jnp
from jax.experimental import pallas as pl
from jax.experimental.pallas import tpu as pltpu

OUT_H = 224
OUT_W = 224
COL = 256                       # per-channel, lane-aligned column block
IMAGENET_MEAN = (0.485, 0.456, 0.406)
IMAGENET_STD = (0.229, 0.224, 0.225)


def _resize_matrix(out_size: int, in_size: int) -> jnp.ndarray:
    """(out_size, in_size) matrix M so that y = M @ x resizes axis 0.

    Triangle (bilinear) filter with half-pixel centers.  When downscaling the
    support is widened by the scale factor (antialias=True, torchvision's
    tensor default); when upscaling this reduces to standard
    align_corners=False bilinear with edge clamping.
    """
    scale = in_size / out_size
    support = max(scale, 1.0)
    i = jnp.arange(out_size, dtype=jnp.float32)
    center = (i + 0.5) * scale                         # in input coordinates
    j = jnp.arange(in_size, dtype=jnp.float32)
    t = (j[None, :] + 0.5 - center[:, None]) / support
    w = jnp.clip(1.0 - jnp.abs(t), 0.0, 1.0)
    return w / jnp.sum(w, axis=1, keepdims=True)


def _choose_tiling(wc: int, h: int, in_bytes: int, budget: int):
    """Pick the W*C tile size (twc) and the (possibly padded) flattened width."""
    if h * wc * in_bytes <= budget:
        return wc, wc                                   # single tile, no pad
    max_twc = max(128, (budget // (h * in_bytes)) // 128 * 128)
    if wc % 128 == 0:
        twc = min(max_twc, wc)
        twc = (twc // 128) * 128
        while twc > 128 and wc % twc != 0:
            twc -= 128
        if wc % twc == 0:
            return twc, wc
    # Awkward width: zero-pad the flattened axis so 128-aligned tiles divide it.
    twc = max_twc
    wc_pad = ((wc + twc - 1) // twc) * twc
    return twc, wc_pad


def _vmem_estimate(h: int, twc: int, in_bytes: int, n2: int) -> int:
    """Approximate VMEM footprint: double-buffered blocks + scratch + temps."""
    rup = lambda v, m: ((v + m - 1) // m) * m
    hp = rup(h, 8)
    x_blk = hp * rup(twc, 128) * in_bytes
    b2_blk = rup(twc, 8) * n2 * 2
    a_blk = OUT_H * rup(h, 128) * 2
    o_blk = 3 * OUT_H * rup(OUT_W, 128) * 4
    acc_f32 = hp * n2 * 4
    temps = x_blk // 2 + hp * n2 * 2 + OUT_H * n2 * 4   # bf16 casts + epilogue result
    return 2 * (x_blk + b2_blk + a_blk + o_blk) + acc_f32 + temps


def _make_kernel(num_ch: int):
    def kernel(bias_ref, x_ref, b2_ref, a_ref, o_ref, acc_ref):
        """bias: SMEM (C,) f32; x: (1,H,twc); b2: (twc, C*COL) bf16;
        a: (224,H) bf16 (resident); o: (1,C,224,224) f32; acc: (H, C*COL) f32."""
        k = pl.program_id(1)

        @pl.when(k == 0)
        def _init():
            acc_ref[...] = jnp.zeros_like(acc_ref)

        # Hot loop: one big matmul per W*C tile (M=H, K=twc, N=C*COL).
        x_tile = x_ref[0].astype(jnp.bfloat16)               # (H, twc)
        acc_ref[...] += jnp.dot(x_tile, b2_ref[...],
                                preferred_element_type=jnp.float32)

        @pl.when(k == pl.num_programs(1) - 1)
        def _finish():
            # Height resize once per image; /255 and 1/std already folded into
            # b2, so only the per-channel bias add remains.
            res = jnp.dot(a_ref[...], acc_ref[...].astype(jnp.bfloat16),
                          preferred_element_type=jnp.float32)  # (224, C*COL)
            for c in range(num_ch):
                o_ref[0, c] = res[:, c * COL:c * COL + OUT_W] + bias_ref[c]

    return kernel


def preprocess(x_nhwc: jnp.ndarray) -> jnp.ndarray:
    """(B, H, W, 3) pixel values in [0, 255] -> (B, 3, 224, 224) float32."""
    B, H, W, C = x_nhwc.shape
    assert C == 3, "PreprocessModule expects 3-channel (RGB) input"
    if not jnp.issubdtype(x_nhwc.dtype, jnp.floating):
        x_nhwc = x_nhwc.astype(jnp.float32)
    in_bytes = x_nhwc.dtype.itemsize

    # Free (metadata-only) view -- this *is* the module's permute, absorbed.
    wc = W * C
    x2d = x_nhwc.reshape(B, H, wc)

    # Chip-aware tile budget / VMEM limit.
    try:
        vmem_cap = int(pltpu.get_tpu_info().vmem_capacity_bytes)
    except Exception:
        vmem_cap = 64 << 20                                 # v7x-sized fallback
    budget = (20 << 20) if vmem_cap >= (96 << 20) else (8 << 20)

    twc, wc_pad = _choose_tiling(wc, H, in_bytes, budget)
    if wc_pad != wc:
        x2d = jnp.pad(x2d, ((0, 0), (0, 0), (0, wc_pad - wc)))
    nk = wc_pad // twc

    mean = jnp.asarray(IMAGENET_MEAN, jnp.float32)
    std = jnp.asarray(IMAGENET_STD, jnp.float32)
    scale = 1.0 / (255.0 * std)                  # /255 folded into the weights
    bias = -mean / std

    # Width-resize matrix in the flattened (w*C + c) row space:
    #   b2[w*C + c, c*COL + t] = Bw[t, w] * scale[c]   (zeros elsewhere).
    bw_t = _resize_matrix(OUT_W, W).T            # (W, 224)
    n2 = C * COL
    b2 = jnp.zeros((wc_pad, n2), jnp.float32)
    rows = jnp.arange(W) * C
    for c in range(C):
        b2 = b2.at[rows + c, c * COL:c * COL + OUT_W].set(bw_t * scale[c])
    b2 = b2.astype(jnp.bfloat16)

    a_mat = _resize_matrix(OUT_H, H).astype(jnp.bfloat16)    # (224, H)

    est = _vmem_estimate(H, twc, in_bytes, n2)
    vmem_limit = int(max(32 << 20, min(est + (8 << 20), int(0.8 * vmem_cap))))

    return pl.pallas_call(
        _make_kernel(C),
        out_shape=jax.ShapeDtypeStruct((B, C, OUT_H, OUT_W), jnp.float32),
        grid=(B, nk),
        in_specs=[
            pl.BlockSpec(memory_space=pltpu.MemorySpace.SMEM),        # bias (3,)
            pl.BlockSpec((1, H, twc), lambda b, k: (b, 0, k)),        # image tile
            pl.BlockSpec((twc, n2), lambda b, k: (k, 0)),             # B2 tile
            pl.BlockSpec((OUT_H, H), lambda b, k: (0, 0)),            # A (resident)
        ],
        out_specs=pl.BlockSpec((1, C, OUT_H, OUT_W), lambda b, k: (b, 0, 0, 0)),
        scratch_shapes=[pltpu.VMEM((H, n2), jnp.float32)],
        compiler_params=pltpu.CompilerParams(
            dimension_semantics=("parallel", "arbitrary"),
            vmem_limit_bytes=vmem_limit),
    )(bias, x2d, b2, a_mat)


if __name__ == "__main__":
    key = jax.random.PRNGKey(0)
    B, H, W, C = 2, 16, 16, 3
    x = jax.random.uniform(key, (B, H, W, C), dtype=jnp.float32) * 255.0

    y = jax.block_until_ready(preprocess(x))
    assert y.shape == (B, 3, OUT_H, OUT_W), y.shape
    assert y.dtype == jnp.float32

    # Pure-JAX f32 reference (same separable-resize formulation).
    a_f = _resize_matrix(OUT_H, H)
    b_f = _resize_matrix(OUT_W, W)
    mean = jnp.asarray(IMAGENET_MEAN, jnp.float32)
    std = jnp.asarray(IMAGENET_STD, jnp.float32)
    x_nchw = jnp.transpose(x, (0, 3, 1, 2))
    ref = jnp.einsum('oh,bchw,tw->bcot', a_f, x_nchw, b_f)
    ref = (ref / 255.0 - mean[None, :, None, None]) / std[None, :, None, None]
    err = float(jnp.max(jnp.abs(y - ref)))
    assert err < 0.1, f"max abs error vs f32 reference too large: {err}"

    print("KERNEL_OK")
</pallas_src>

<mosaic_0001>
module attributes {stable_mosaic.version = 11 : i64} {
  func.func @kernel(%arg0: i32, %arg1: i32, %arg2: memref<3xf32, #tpu.memory_space<smem>>, %arg3: memref<1x16x48xf32, #tpu.memory_space<vmem>>, %arg4: memref<48x768xbf16, #tpu.memory_space<vmem>>, %arg5: memref<224x16xbf16, #tpu.memory_space<vmem>>, %arg6: memref<1x3x224x224xf32, #tpu.memory_space<vmem>>, %arg7: memref<16x768xf32, #tpu.memory_space<vmem>>) attributes {dimension_semantics = [#tpu.dimension_semantics<parallel>, #tpu.dimension_semantics<arbitrary>], iteration_bounds = array<i64: 2, 1>, scalar_prefetch = 0 : i64, scratch_operands = 1 : i64, tpu.core_type = #tpu.core_type<tc>, window_params = [{transform_indices = @transform_0, window_bounds = array<i64: 3>}, {transform_indices = @transform_1, window_bounds = array<i64: 1, 16, 48>}, {transform_indices = @transform_2, window_bounds = array<i64: 48, 768>}, {pipeline_mode = #tpu.pipeline_mode<synchronous>, transform_indices = @transform_3, window_bounds = array<i64: 224, 16>}, {transform_indices = @transform_4, window_bounds = array<i64: 1, 3, 224, 224>}]} {
    %c0_i32 = arith.constant 0 : i32
    %0 = arith.cmpi eq, %arg1, %c0_i32 : i32
    %1 = arith.extui %0 : i1 to i32
    %c0_i32_0 = arith.constant 0 : i32
    %2 = arith.cmpi ne, %1, %c0_i32_0 : i32
    scf.if %2 {
      %cst_11 = arith.constant 0.000000e+00 : f32
      %14 = vector.broadcast %cst_11 : f32 to vector<16x768xf32>
      %c0_12 = arith.constant 0 : index
      %c0_13 = arith.constant 0 : index
      %15 = vector.load %arg7[%c0_12, %c0_13] : memref<16x768xf32, #tpu.memory_space<vmem>>, vector<16x768xf32>
      tpu.vector_store %arg7[%c0_12, %c0_13], %14 {strides = array<i32>} : memref<16x768xf32, #tpu.memory_space<vmem>>, vector<16x768xf32>,
    } else {
    }
    %c0 = arith.constant 0 : index
    %c0_1 = arith.constant 0 : index
    %c0_2 = arith.constant 0 : index
    %3 = vector.load %arg3[%c0, %c0_1, %c0_2] : memref<1x16x48xf32, #tpu.memory_space<vmem>>, vector<1x16x48xf32>
    %4 = vector.shape_cast %3 : vector<1x16x48xf32> to vector<16x48xf32>
    %5 = arith.truncf %4 : vector<16x48xf32> to vector<16x48xbf16>
    %c0_3 = arith.constant 0 : index
    %c0_4 = arith.constant 0 : index
    %6 = vector.load %arg7[%c0_3, %c0_4] : memref<16x768xf32, #tpu.memory_space<vmem>>, vector<16x768xf32>
    %c0_5 = arith.constant 0 : index
    %c0_6 = arith.constant 0 : index
    %7 = vector.load %arg4[%c0_5, %c0_6] : memref<48x768xbf16, #tpu.memory_space<vmem>>, vector<48x768xbf16>
    %cst = arith.constant dense<0.000000e+00> : vector<16x768xf32>
    %8 = tpu.matmul %5, %7, %cst {dimension_numbers = #tpu.dot_dimension_numbers<[1], [0], [0], [1], [0, 0, 1, 1], [], []>} : vector<16x48xbf16>, vector<48x768xbf16>, vector<16x768xf32> -> vector<16x768xf32>
    %9 = arith.addf %6, %8 : vector<16x768xf32>
    %c0_7 = arith.constant 0 : index
    %c0_8 = arith.constant 0 : index
    %10 = vector.load %arg7[%c0_7, %c0_8] : memref<16x768xf32, #tpu.memory_space<vmem>>, vector<16x768xf32>
    tpu.vector_store %arg7[%c0_7, %c0_8], %9 {strides = array<i32>} : memref<16x768xf32, #tpu.memory_space<vmem>>, vector<16x768xf32>,
    %c0_i32_9 = arith.constant 0 : i32
    %11 = arith.cmpi eq, %arg1, %c0_i32_9 : i32
    %12 = arith.extui %11 : i1 to i32
    %c0_i32_10 = arith.constant 0 : i32
    %13 = arith.cmpi ne, %12, %c0_i32_10 : i32
    scf.if %13 {
      %c0_11 = arith.constant 0 : index
      %c0_12 = arith.constant 0 : index
      %14 = vector.load %arg5[%c0_11, %c0_12] : memref<224x16xbf16, #tpu.memory_space<vmem>>, vector<224x16xbf16>
      %c0_13 = arith.constant 0 : index
      %c0_14 = arith.constant 0 : index
      %15 = vector.load %arg7[%c0_13, %c0_14] : memref<16x768xf32, #tpu.memory_space<vmem>>, vector<16x768xf32>
      %16 = arith.truncf %15 : vector<16x768xf32> to vector<16x768xbf16>
      %cst_15 = arith.constant dense<0.000000e+00> : vector<224x768xf32>
      %17 = tpu.matmul %14, %16, %cst_15 {dimension_numbers = #tpu.dot_dimension_numbers<[1], [0], [0], [1], [0, 0, 1, 1], [], []>} : vector<224x16xbf16>, vector<16x768xbf16>, vector<224x768xf32> -> vector<224x768xf32>
      %18 = vector.extract_strided_slice %17 {offsets = [0, 0], sizes = [224, 224], strides = [1, 1]} : vector<224x768xf32> to vector<224x224xf32>
      %c0_16 = arith.constant 0 : index
      %19 = memref.load %arg2[%c0_16] : memref<3xf32, #tpu.memory_space<smem>>
      %20 = vector.broadcast %19 : f32 to vector<224x224xf32>
      %21 = arith.addf %18, %20 : vector<224x224xf32>
      %c0_17 = arith.constant 0 : index
      %c0_18 = arith.constant 0 : index
      %c0_19 = arith.constant 0 : index
      %c0_20 = arith.constant 0 : index
      %22 = vector.load %arg6[%c0_17, %c0_18, %c0_19, %c0_20] : memref<1x3x224x224xf32, #tpu.memory_space<vmem>>, vector<1x1x224x224xf32>
      %23 = vector.shape_cast %22 : vector<1x1x224x224xf32> to vector<224x224xf32>
      %24 = vector.shape_cast %21 : vector<224x224xf32> to vector<1x1x224x224xf32>
      tpu.vector_store %arg6[%c0_17, %c0_18, %c0_19, %c0_20], %24 {strides = array<i32>} : memref<1x3x224x224xf32, #tpu.memory_space<vmem>>, vector<1x1x224x224xf32>,
      %25 = vector.extract_strided_slice %17 {offsets = [0, 256], sizes = [224, 224], strides = [1, 1]} : vector<224x768xf32> to vector<224x224xf32>
      %c1 = arith.constant 1 : index
      %26 = memref.load %arg2[%c1] : memref<3xf32, #tpu.memory_space<smem>>
      %27 = vector.broadcast %26 : f32 to vector<224x224xf32>
      %28 = arith.addf %25, %27 : vector<224x224xf32>
      %c0_21 = arith.constant 0 : index
      %c1_22 = arith.constant 1 : index
      %c0_23 = arith.constant 0 : index
      %c0_24 = arith.constant 0 : index
      %29 = vector.load %arg6[%c0_21, %c1_22, %c0_23, %c0_24] : memref<1x3x224x224xf32, #tpu.memory_space<vmem>>, vector<1x1x224x224xf32>
      %30 = vector.shape_cast %29 : vector<1x1x224x224xf32> to vector<224x224xf32>
      %31 = vector.shape_cast %28 : vector<224x224xf32> to vector<1x1x224x224xf32>
      tpu.vector_store %arg6[%c0_21, %c1_22, %c0_23, %c0_24], %31 {strides = array<i32>} : memref<1x3x224x224xf32, #tpu.memory_space<vmem>>, vector<1x1x224x224xf32>,
      %32 = vector.extract_strided_slice %17 {offsets = [0, 512], sizes = [224, 224], strides = [1, 1]} : vector<224x768xf32> to vector<224x224xf32>
      %c2 = arith.constant 2 : index
      %33 = memref.load %arg2[%c2] : memref<3xf32, #tpu.memory_space<smem>>
      %34 = vector.broadcast %33 : f32 to vector<224x224xf32>
      %35 = arith.addf %32, %34 : vector<224x224xf32>
      %c0_25 = arith.constant 0 : index
      %c2_26 = arith.constant 2 : index
      %c0_27 = arith.constant 0 : index
      %c0_28 = arith.constant 0 : index
      %36 = vector.load %arg6[%c0_25, %c2_26, %c0_27, %c0_28] : memref<1x3x224x224xf32, #tpu.memory_space<vmem>>, vector<1x1x224x224xf32>
      %37 = vector.shape_cast %36 : vector<1x1x224x224xf32> to vector<224x224xf32>
      %38 = vector.shape_cast %35 : vector<224x224xf32> to vector<1x1x224x224xf32>
      tpu.vector_store %arg6[%c0_25, %c2_26, %c0_27, %c0_28], %38 {strides = array<i32>} : memref<1x3x224x224xf32, #tpu.memory_space<vmem>>, vector<1x1x224x224xf32>,
    } else {
    }
    return
  }
  func.func @transform_0(%arg0: i32, %arg1: i32) -> i32 {
    %c0_i32 = arith.constant 0 : i32
    %c0_i32_0 = arith.constant 0 : i32
    return %c0_i32 : i32
  }
  func.func @transform_1(%arg0: i32, %arg1: i32) -> (i32, i32, i32) {
    %c0_i32 = arith.constant 0 : i32
    %c0_i32_0 = arith.constant 0 : i32
    return %arg0, %c0_i32, %arg1 : i32, i32, i32
  }
  func.func @transform_2(%arg0: i32, %arg1: i32) -> (i32, i32) {
    %c0_i32 = arith.constant 0 : i32
    %c0_i32_0 = arith.constant 0 : i32
    return %arg1, %c0_i32 : i32, i32
  }
  func.func @transform_3(%arg0: i32, %arg1: i32) -> (i32, i32) {
    %c0_i32 = arith.constant 0 : i32
    %c0_i32_0 = arith.constant 0 : i32
    %c0_i32_1 = arith.constant 0 : i32
    return %c0_i32, %c0_i32_0 : i32, i32
  }
  func.func @transform_4(%arg0: i32, %arg1: i32) -> (i32, i32, i32, i32) {
    %c0_i32 = arith.constant 0 : i32
    %c0_i32_0 = arith.constant 0 : i32
    %c0_i32_1 = arith.constant 0 : i32
    %c0_i32_2 = arith.constant 0 : i32
    return %arg0, %c0_i32, %c0_i32_0, %c0_i32_1 : i32, i32, i32, i32
  }
}

</mosaic_0001>

<bundles_post_ra>
// kernel: tpu_custom_call.1
= control target key start
LH: loop header
LB: loop body
LE: loop exit
PB: predicated region body
PF: predicated region fallthrough
CT: control target
= control target key end

     0   :  { %9 = vsyncpa [#allocation6], 0  ;;  %s3084_s0 = inlined_call_operand.hbm [shape: f32[3], index: 0, kind: input, shape index: {}]   ;;  %s3085_s1 = inlined_call_operand.hbm [shape: f32[2,16,48], index: 1, kind: input, shape index: {}]   ;;  %s3086_s2 = inlined_call_operand.hbm [shape: bf16[48,768], index: 2, kind: input, shape index: {}]   ;;  %s3087_s3 = inlined_call_operand.vmem [shape: bf16[224,16], index: 3, kind: input, shape index: {}]   ;;  %s3088_s4 = inlined_call_operand.hbm [shape: f32[2,3,224,224], index: 4, kind: output, shape index: {}]  }
   0x1   :  { %10 = vsyncpa [#allocation4], 0 }
   0x2   :  { %12 = vsyncpa [#allocation4 + $0x1], 0 }
   0x3   :  { %13 = vsyncpa [#allocation9], 0 }
   0x4   :  { %14 = vsyncpa [#allocation5], 0 }
   0x5   :  { %16 = vsyncpa [#allocation5 + $0x1], 0  ;;  %s2254_s15 = smov 0   ;;  %s2256_s16 = smov 0  }
   0x6   :  { %s2258_s17 = smov 0   ;;  %s2260_s18 = smov 0  }
   0x7   :  { %s2262_s19 = smov 0   ;;  %s2264_s20 = smov 0  }
   0x8 LB: > { %s1712_s21 = sadd.s32 4294967295, %s2216_s20   ;;  %s1713_s22 = sadd.s32 4294967294, %s2216_s20   ;;  %s2216_s20 = sphi %s2264_s20, %s22_s20   ;;  %s2212_s19 = sphi %s2262_s19, %s3110_s19   ;;  %s2208_s18 = sphi %s2260_s18, %s3109_s18   ;;  %s2204_s17 = sphi %s2258_s17, %s3108_s17   ;;  %s2200_s16 = sphi %s2256_s16, %s3107_s16   ;;  %s2196_s15 = sphi %s2254_s15, %s3106_s15  }
   0x9   : > { %s64_s23 = sadd.s32 1, %s2204_s17  ;;  %p71_p0 = scmp.ne.s32.totalorder %s2204_s17, %s2200_s16 }
   0xa   : > { %p72_p1 = scmp.eq.s32.totalorder %s2216_s20, 0  ;;  %p77_p2 = scmp.ne.s32.totalorder %s2200_s16, %s2196_s15 }
   0xb   : > { %p2292_p3 = scmp.eq.s32.totalorder %s1712_s21, 0  ;;  %p148_p4 = scmp.eq.s32.totalorder %s1712_s21, 1 }
   0xc   : > { %p73_p5 = por %p72_p1, %p71_p0  ;;  %p154_p6 = scmp.eq.s32.totalorder %s1713_s22, 1 }
   0xd   : > { %s3093_s24 = scalar_select %p2292_p3, 1, 0 }
   0xe   : > { %p2298_p7 = por %p2292_p3, %p77_p2  ;;  %p2302_p8 = por %p148_p4, %p71_p0 }
   0xf   : > { %p2306_p9 = por %p154_p6, %p77_p2  ;;  %p1714_p10 = scmp.ge.s32.totalorder %s2216_s20, 1 }
  0x10   : > { %s3094_s25 = scalar_select %p2298_p7, 1, 0 }
  0x11   : > { %s3095_s26 = scalar_select %p2302_p8, 1, 0 }
  0x12   : > { %s3096_s27 = scalar_select %p2306_p9, 1, 0 }
  0x13   : > { %p161_p11 = scmp.lt.s32.totalorder %s2216_s20, 3  ;;  %p1953_p1 = scmp.lt.s32.totalorder %s2216_s20, 2 }
  0x14   : > { %s2218_s30 = smov [#allocation8]   ;;  %p3099_p0 = scmp.ne.s32.totalorder %s3093_s24, 0 }
  0x15   : > { %p2313_p13 = pnand %p1714_p10, %p161_p11  ;;  %p2320_p7 = pnand %p1953_p1, %p73_p5 }
  0x16   : > { %s186_s5 = sshll.u32 %s2218_s30, 4  ;;  %s2055_s9 = scalar_lea.hbm %s3084_s0, 16  ;;  %s2330_s5 = int_to_ptr.vmem [resolvable:$true] %s186_s5 }
  0x17   : > { %p1936_p3 = pneg %p2313_p13  ;;  %p2056_p4 = scmp.ne.s32.totalorder %s3084_s0, %s2055_s9 }
  0x18   : > { %p2062_p10 = scmp.lt.u32.totalorder %s2055_s9, %s3084_s0 }
  0x19   : > { %p2326_p2 = pnand %p1936_p3, %p3099_p0 }
  0x1b   : > { %p2057_p5 = pneg %p2326_p2 }
  0x1d   : > { %p2058_p3 = pnand %p2057_p5, %p2056_p4 }
  0x1f   : > { %p2059_p6 = pneg %p2058_p3 }
  0x21   : > { %p2064_p11 = pnand %p2062_p10, %p2059_p6 }
  0x23   : > { %2067 = shalt.err (!%p2064_p11)
}
  0x24   : > { %s2219_s14 = smov [#allocation3]   ;;  %s2068_s8 = scalar_lea.hbm %s3086_s2, 2304 }
  0x25   : > { %1939 = dma.hbm_to_smem (!%p2326_p2), %s3084_s0, 16, %s2219_s14, [#allocation6]  }
  0x26   : > { %p2069_p1 = scmp.ne.s32.totalorder %s3086_s2, %s2068_s8  ;;  %p2075_p3 = scmp.lt.u32.totalorder %s2068_s8, %s3086_s2 }
  0x28   : > { %p2071_p0 = pnand %p2069_p1, %p2057_p5 }
  0x2a   : > { %p2072_p4 = pneg %p2071_p0 }
  0x2c   : > { %p2077_p6 = pnand %p2075_p3, %p2072_p4 }
  0x2e   : > { %2080 = shalt.err (!%p2077_p6)
}
  0x2f   : > { %s2081_s13 = scalar_lea.vmem %s2330_s5, 2304  ;;  %p2089_p9 = scmp.lt.s32.totalorder %s2330_s5, %s2330_s5 }
  0x30   : > { %p2082_p10 = scmp.ne.s32.totalorder %s2330_s5, %s2081_s13  ;;  %p2090_p1 = scmp.lt.s32.totalorder %s2081_s13, %s2081_s13 }
  0x32   : > { %p2084_p11 = pnand %p2082_p10, %p2057_p5  ;;  %p2091_p0 = por %p2090_p1, %p2089_p9 }
  0x34   : > { %p2085_p12 = pneg %p2084_p11 }
  0x36   : > { %p2092_p8 = pnand %p2091_p0, %p2085_p12 }
  0x38   : > { %2095 = shalt.err (!%p2092_p8)
}
  0x39   : > { %s2220_s14 = smov 384   ;;  %s2221_s21 = smov 24  }
  0x3a   : > { %1942 = dma.hbm_to_vmem [thread:$0]  (!%p2326_p2), %s3086_s2, 2304, %s2330_s5, [#allocation9], %s2220_s14, %s2220_s14, %s2221_s21  }
  0x3b   : > { %s34_s7 = sadd.s32 1, %s2212_s19  ;;  %s203_s8 = sand.u32 1, %s2204_s17  }
  0x3c   : > { %p36_p8 = scmp.ge.s32.totalorder %s34_s7, 2  ;;  %s1718_s10 = sshll.u32 %s203_s8, 4 }
  0x3d   : > { %s1919_s11 = sshll.u32 %s2212_s19, 8  ;;  %s207_s5 = scalar_lea.vmem [#allocation7], %s1718_s10 }
  0x3e   : > { %s3112_s7 = smov (%p36_p8, %s34_s7), 0  ;;  %s2384_s13 = scalar_lea.hbm %s3085_s1, %s1919_s11 }
  0x3f   : > { %s59_s6 = ssub.s32 %s2212_s19, %s3112_s7  ;;  %s215_s14 = sshll.u32 %s207_s5, 4  ;;  %s2388_s14 = int_to_ptr.vmem [resolvable:$true] %s215_s14 }
  0x40   : > { %p62_p9 = scmp.eq.s32.totalorder %s59_s6, 0  ;;  %s2395_s22 = scalar_lea.sflag [#allocation4], %s203_s8 }
  0x41   : > { %s2096_s30 = scalar_lea.hbm %s2384_s13, 256  ;;  %p2098_p2 = pneg %p2320_p7 }
  0x42   : > { %s2393_s21 = scalar_select %p62_p9, %s2204_s17, %s64_s23  }
  0x43   : > { %p2097_p12 = scmp.ne.s32.totalorder %s2384_s13, %s2096_s30  ;;  %s2101_s10 = scalar_lea.hbm %s3085_s1, 512 }
  0x44   : > { %p2102_p3 = scmp.lt.u32.totalorder %s2384_s13, %s3085_s1  ;;  %p2103_p6 = scmp.lt.u32.totalorder %s2101_s10, %s2096_s30 }
  0x45   : > { %p2099_p5 = pnand %p2098_p2, %p2097_p12  ;;  %p2105_p11 = scmp.lt.u32.totalorder %s2096_s30, %s2384_s13 }
  0x46   : > { %p2104_p10 = por %p2103_p6, %p2102_p3 }
  0x47   : > { %p2100_p4 = pneg %p2099_p5 }
  0x48   : > { %p2106_p1 = por %p2105_p11, %p2104_p10 }
  0x4a   : > { %p2107_p0 = pnand %p2106_p1, %p2100_p4 }
  0x4c   : > { %2110 = shalt.err (!%p2107_p0)
}
  0x4d   : > { %s2111_s23 = scalar_lea.vmem %s2388_s14, 256  ;;  %s2222_s8 = smov [#allocation7]  }
  0x4e   : > { %p2112_p8 = scmp.ne.s32.totalorder %s2388_s14, %s2111_s23  ;;  %s2116_s5 = sshll.u32 %s2222_s8, 4  ;;  %s2117_s5 = int_to_ptr.vmem [resolvable:$false] %s2116_s5 }
  0x4f   : > { %s2118_s11 = scalar_lea.vmem %s2117_s5, 512  ;;  %p2119_p5 = scmp.lt.s32.totalorder %s2388_s14, %s2117_s5 }
  0x50   : > { %p2114_p9 = pnand %p2112_p8, %p2098_p2  ;;  %p2120_p3 = scmp.lt.s32.totalorder %s2118_s11, %s2111_s23 }
  0x52   : > { %p2115_p12 = pneg %p2114_p9  ;;  %p2121_p6 = por %p2120_p3, %p2119_p5 }
  0x54   : > { %p2122_p10 = pnand %p2121_p6, %p2115_p12 }
  0x56   : > { %2125 = shalt.err (!%p2122_p10)
}
  0x57   : > { %s2223_s30 = smov 128   ;;  %s2224_s9 = smov 8  }
  0x58   : > { %1946 = dma.hbm_to_vmem [thread:$0]  (!%p2320_p7), %s2384_s13, 256, %s2388_s14, %s2395_s22, %s2223_s30, %s2223_s30, %s2224_s9  }
  0x59   : > { %227 = sbr.rel (%p2313_p13) target bundleno = 740 (0x2e4), region = 36  ;;  %p3101_p2 = scmp.ne.s32.totalorder (!%p2313_p13), %s3093_s24, 0 }
  0x60   : > { %2179 = dma.done.wait (%p3101_p2), [#allocation6], 16  }
  0x61   : > { %2181 = vsyncadd (%p3101_p2), [#allocation6], 4294967280  ;;  %s2430_s10 = sand.u32 1, %s2200_s16   ;;  %p3102_p4 = scmp.ne.s32.totalorder %s3094_s25, 0 }
  0x62   : > { %s1723_s12 = sshll.u32 %s2430_s10, 4  ;;  %s234_s6 = scalar_lea.sflag [#allocation4], %s2430_s10 }
  0x63   : > { %s237_s23 = scalar_lea.vmem [#allocation7], %s1723_s12 }
  0x64   : > { %2183 = dma.done.wait (%p3102_p4), %s234_s6, 256  }
  0x65   : > { %2185 = vsyncadd (%p3102_p4), %s234_s6, 4294967040 }
  0x66   : > { %2187 = dma.done.wait (%p3101_p2), [#allocation9], 2304  }
  0x67   : > { %2189 = vsyncadd (%p3101_p2), [#allocation9], 4294964992 }
  0x68   : > { %246 = sfence }
  0x69   : > { %v2014_v0 = vld [vmem:[#allocation8 + $0x4] ss:$24 sps:$4 sm:$0xff]   ;;  %v2016_v1 = vld [vmem:[#allocation8] ss:$24 sps:$4 sm:$0xff]   ;;  %v2225_v2 = vmov 0   ;;  %vm408_vm0 = vcmask 392192  }
  0x6a   : > { %444 = vmatprep.mubr.bf16.mxu0 %v2225_v2  ;;  %487 = vmatprep.mubr.bf16.mxu1 %v2225_v2  ;;  %v2017_v3 = vld [vmem:[#allocation8 + $0x34] ss:$24 sps:$4 sm:$0xff]   ;;  %v2019_v4 = vld [vmem:[#allocation8 + $0x30] ss:$24 sps:$4 sm:$0xff]   ;;  %v2020_v5 = vld [vmem:[#allocation8 + $0x64] ss:$24 sps:$4 sm:$0xff]  }
  0x6b   : > { %412 = vmatprep.subr.bf16.mxu0 %v2014_v0  ;;  %v2022_v6 = vld [vmem:[#allocation8 + $0x60] ss:$24 sps:$4 sm:$0xff]   ;;  %v2025_v9 = vld [vmem:[#allocation8 + $0x14] ss:$24 sps:$4 sm:$0xff]   ;;  %v2023_v10 = vld [vmem:[#allocation8 + $0x10] ss:$24 sps:$4 sm:$0xff]  }
  0x6c   : > { %413 = vmatpush1.bf16.msra.mxu0 %v2016_v1  ;;  %v285_v7 = vld [vmem:[%s237_s23] sm:$0xff]  ;;  %v286_v8 = vld [vmem:[%s237_s23 + $0x8] sm:$0xff]  ;;  %vm684_vm1 = vcmask 130048   ;;  %s1246_s6 = sld [smem:[#allocation3]]  ;;  %s1922_s23 = smul.u32 1344, %s2430_s10  ;;  %vm1305_vm2 = vcmask 785408  }
  0x6d   : > { %414 = vmatprep.subr.bf16.mxu0 %v2017_v3  ;;  %v2032_v11 = vld [vmem:[#allocation8 + $0xc] ss:$24 sps:$4 sm:$0xff]   ;;  %v2034_v12 = vld [vmem:[#allocation8 + $0x8] ss:$24 sps:$4 sm:$0xff]   ;;  %v287_v13 = vpack.c.bf16 %v286_v8, %v285_v7  ;;  %v2035_v14 = vld [vmem:[#allocation8 + $0x3c] ss:$24 sps:$4 sm:$0xff]  }
  0x6e   : > { %v2028_v15 = vld [vmem:[#allocation8 + $0x44] ss:$24 sps:$4 sm:$0xff]   ;;  %455 = vmatprep.subr.bf16.mxu1 %v2032_v11  ;;  %v2037_v16 = vld [vmem:[#allocation8 + $0x38] ss:$24 sps:$4 sm:$0xff]   ;;  %v2031_v19 = vld [vmem:[#allocation8 + $0x74] ss:$24 sps:$4 sm:$0xff]  }
  0x6f   : > { %456 = vmatpush1.bf16.msra.mxu1 %v2034_v12  ;;  %v2038_v17 = vld [vmem:[#allocation8 + $0x6c] ss:$24 sps:$4 sm:$0xff]   ;;  %v2026_v18 = vld [vmem:[#allocation8 + $0x40] ss:$24 sps:$4 sm:$0xff]   ;;  %v2029_v21 = vld [vmem:[#allocation8 + $0x70] ss:$24 sps:$4 sm:$0xff]  }
  0x70   : > { %415 = vmatpush1.bf16.msra.mxu0 %v2019_v4  ;;  %457 = vmatprep.subr.bf16.mxu1 %v2035_v14  ;;  %v2040_v20 = vld [vmem:[#allocation8 + $0x68] ss:$24 sps:$4 sm:$0xff]   ;;  %v2453_v28 = vld [vmem:[%s3087_s3 + $0x30] sm:$0xff]   ;;  %v2469_v39 = vld [vmem:[%s3087_s3 + $0x38] sm:$0xff]   ;;  %s2606_s24 = scalar_lea.vmem [#allocation10], %s1922_s23  ;;  %s1802_s25 = sld [smem:[#allocation3 + $0x1]] }
  0x71   : > { %416 = vmatprep.subr.bf16.mxu0 %v2020_v5  ;;  %v2458_v29 = vld [vmem:[%s3087_s3] sm:$0xff]   ;;  %v2045_v43 = vld [vmem:[%s3087_s3 + $0x8] sm:$0xff]   ;;  %v2047_v45 = vld [vmem:[%s3087_s3 + $0x10] sm:$0xff]   ;;  %s1859_s28 = sld [smem:[#allocation3 + $0x2]]  ;;  %s1923_s29 = smul.u32 21504, %s2208_s18 }
  0x72   : > { %v2482_v44 = vld [vmem:[%s3087_s3 + $0x40] sm:$0xff]   ;;  %v2495_v46 = vld [vmem:[%s3087_s3 + $0x48] sm:$0xff]   ;;  %v2049_v47 = vld [vmem:[%s3087_s3 + $0x18] sm:$0xff]   ;;  %v2600_v54 = vstv %s1246_s6  ;;  %s1605_s13 = sshll.u32 %s2606_s24, 4  ;;  %s1592_s18 = scalar_lea.sflag [#allocation5], %s2430_s10  ;;  %s3029_s13 = int_to_ptr.vmem [resolvable:$true] %s1605_s13 }
  0x73   : > { %458 = vmatpush1.bf16.msra.mxu1 %v2037_v16  ;;  %v2048_v48 = vld [vmem:[%s3087_s3 + $0x50] sm:$0xff]   ;;  %v2051_v49 = vld [vmem:[%s3087_s3 + $0x20] sm:$0xff]   ;;  %v2050_v50 = vld [vmem:[%s3087_s3 + $0x58] sm:$0xff]   ;;  %s3027_s8 = scalar_lea.hbm %s3088_s4, %s1923_s29  ;;  %s2126_s5 = scalar_lea.vmem %s3029_s13, 21504 }
  0x74   : > { %417 = vmatpush1.bf16.msra.mxu0 %v2022_v6  ;;  %459 = vmatprep.subr.bf16.mxu1 %v2038_v17  ;;  %v2053_v51 = vld [vmem:[%s3087_s3 + $0x28] sm:$0xff]   ;;  %v2052_v52 = vld [vmem:[%s3087_s3 + $0x60] sm:$0xff]   ;;  %p2127_p7 = scmp.ne.s32.totalorder %s3029_s13, %s2126_s5  ;;  %p3103_p13 = scmp.ne.s32.totalorder %s3095_s26, 0 }
  0x75   : > { %498 = vmatprep.subr.bf16.mxu0 %v2025_v9  ;;  %v2054_v53 = vld [vmem:[%s3087_s3 + $0x68] sm:$0xff]   ;;  %s2226_s11 = smov [#allocation10]  }
  0x76   : > { %p2128_p11 = pnand %p2127_p7, %p3103_p13  ;;  %s2130_s30 = sshll.u32 %s2226_s11, 4  ;;  %s2131_s30 = int_to_ptr.vmem [resolvable:$false] %s2130_s30 }
  0x77   : > { %1743 = vmatmul.mubr.msk.bf16.vlgmr.msra.gmra.mrb[0].mxu0 %vm408_vm0, %v287_v13  ;;  %460 = vmatpush1.bf16.msra.mxu1 %v2040_v20  ;;  %s2132_s9 = scalar_lea.vmem %s2131_s30, 43008  ;;  %p2133_p0 = scmp.lt.s32.totalorder %s3029_s13, %s2131_s30 }
  0x78   : > { %499 = vmatpush1.bf16.msra.mxu0 %v2023_v10  ;;  %530 = vmatprep.mubr.bf16.mxu0 %v2225_v2  ;;  %p2129_p1 = pneg %p2128_p11  ;;  %p2134_p8 = scmp.lt.s32.totalorder %s2132_s9, %s2126_s5 }
  0x79   : > { %500 = vmatprep.subr.bf16.mxu0 %v2028_v15 }
  0x7a   : > { %1744 = vmatmul.mubr.msk.bf16.vlgmr.msra.gmra.mrb[0].mxu1 %vm408_vm0, %v287_v13  ;;  %p2135_p9 = por %p2134_p8, %p2133_p0 }
  0x7b   : > { %819 = vmatprep.mubr.bf16.mxu1 %v2225_v2 }
  0x7c   : > { %501 = vmatpush1.bf16.msra.mxu0 %v2026_v18  ;;  %p2136_p12 = pnand %p2135_p9, %p2129_p1 }
  0x7d   : > { %502 = vmatprep.subr.bf16.mxu0 %v2031_v19 }
  0x80   : > { %503 = vmatpush1.bf16.msra.mxu0 %v2029_v21 }
  0x83   : > { %1745 = vmatmul.mubr.msk.bf16.vlgmr.msra.gmra.mrb[4].mxu0 %vm408_vm0, %v287_v13 }
  0x84   : > { %759 = vmatprep.mubr.bf16.mxu0 %v2225_v2 }
 0x14a   : > { %v446_v22 = vpop.f32.mrb[0].mxu0 }
 0x14b   : > { %v448_v23 = vpop.f32.mrb[1].mxu0 }
 0x14c   : > { %v450_v24 = vpop.f32.mrb[2].mxu0 }
 0x14d   : > { %v608_v25 = vpack.c.bf16 %v450_v24, %v446_v22  ;;  %v452_v26 = vpop.f32.mrb[3].mxu0  ;;  %v489_v30 = vpop.f32.mrb[0].mxu1 }
 0x14e   : > { %v609_v27 = vpack.c.bf16 %v452_v26, %v448_v23  ;;  %v491_v31 = vpop.f32.mrb[1].mxu1 }
 0x14f   : > { %v493_v32 = vpop.f32.mrb[2].mxu1 }
 0x150   : > { %727 = vmatprep.subr.bf16.mxu0 %v609_v27  ;;  %1920 = vmatprep.subr.bf16.mxu1 %v609_v27  ;;  %v610_v34 = vpack.c.bf16 %v493_v32, %v489_v30  ;;  %v495_v35 = vpop.f32.mrb[3].mxu1 }
 0x151   : > { %728 = vmatpush1.bf16.msra.mxu0 %v608_v25  ;;  %1921 = vmatpush1.bf16.msra.mxu1 %v608_v25  ;;  %v611_v37 = vpack.c.bf16 %v495_v35, %v491_v31 }
 0x153   : > { %900 = vmatprep.subr.bf16.mxu0 %v611_v37 }
 0x154   : > { %1766 = vmatmul.mubr.msk.bf16.vlgmr.msra.gmra.mrb[4].mxu1 %vm684_vm1, %v2453_v28  ;;  %1760 = vmatmul.mubr.msk.bf16.vlgmr.msra.gmra.mrb[8].mxu0 %vm684_vm1, %v2458_v29 }
 0x155   : > { %829 = vmatprep.mubr.bf16.mxu1 %v2225_v2  ;;  %769 = vmatprep.mubr.bf16.mxu0 %v2225_v2 }
 0x156   : > { %v532_v33 = vpop.f32.mrb[4].mxu0  ;;  %901 = vmatpush1.bf16.msra.mxu0 %v610_v34 }
 0x157   : > { %v534_v36 = vpop.f32.mrb[5].mxu0 }
 0x158   : > { %v536_v38 = vpop.f32.mrb[6].mxu0 }
 0x159   : > { %v612_v40 = vpack.c.bf16 %v536_v38, %v532_v33  ;;  %v538_v41 = vpop.f32.mrb[7].mxu0 }
 0x15a   : > { %v613_v42 = vpack.c.bf16 %v538_v41, %v534_v36 }
 0x15c   : > { %1073 = vmatprep.subr.bf16.mxu1 %v613_v42  ;;  %1767 = vmatmul.mubr.msk.bf16.gmra.mrb[8].mxu1 %vm684_vm1, %v2469_v39 }
 0x15d   : > { %1074 = vmatpush1.bf16.msra.mxu1 %v612_v40  ;;  %839 = vmatprep.mubr.bf16.mxu1 %v2225_v2 }
 0x15e   : > { %1761 = vmatmul.mubr.msk.bf16.gmra.mrb[12].mxu0 %vm684_vm1, %v2045_v43 }
 0x15f   : > { %779 = vmatprep.mubr.bf16.mxu0 %v2225_v2 }
 0x164   : > { %1768 = vmatmul.mubr.msk.bf16.gmra.mrb[12].mxu1 %vm684_vm1, %v2482_v44 }
 0x165   : > { %849 = vmatprep.mubr.bf16.mxu1 %v2225_v2 }
 0x166   : > { %1762 = vmatmul.mubr.msk.bf16.gmra.mrb[16].mxu0 %vm684_vm1, %v2047_v45 }
 0x167   : > { %789 = vmatprep.mubr.bf16.mxu0 %v2225_v2 }
 0x16c   : > { %1769 = vmatmul.mubr.msk.bf16.gmra.mrb[16].mxu1 %vm684_vm1, %v2495_v46 }
 0x16d   : > { %859 = vmatprep.mubr.bf16.mxu1 %v2225_v2 }
 0x16e   : > { %1763 = vmatmul.mubr.msk.bf16.gmra.mrb[20].mxu0 %vm684_vm1, %v2049_v47 }
 0x16f   : > { %799 = vmatprep.mubr.bf16.mxu0 %v2225_v2 }
 0x174   : > { %1770 = vmatmul.mubr.msk.bf16.gmra.mrb[20].mxu1 %vm684_vm1, %v2048_v48 }
 0x175   : > { %869 = vmatprep.mubr.bf16.mxu1 %v2225_v2 }
 0x176   : > { %1764 = vmatmul.mubr.msk.bf16.gmra.mrb[24].mxu0 %vm684_vm1, %v2051_v49 }
 0x177   : > { %809 = vmatprep.mubr.bf16.mxu0 %v2225_v2 }
 0x17c   : > { %1771 = vmatmul.mubr.msk.bf16.gmra.mrb[24].mxu1 %vm684_vm1, %v2050_v50 }
 0x17d   : > { %879 = vmatprep.mubr.bf16.mxu1 %v2225_v2 }
 0x17e   : > { %1765 = vmatmul.mubr.msk.bf16.gmra.mrb[28].mxu0 %vm684_vm1, %v2053_v51 }
 0x17f   : > { %932 = vmatprep.mubr.bf16.mxu0 %v2225_v2 }
 0x184   : > { %1772 = vmatmul.mubr.msk.bf16.gmra.mrb[28].mxu1 %vm684_vm1, %v2052_v52 }
 0x185   : > { %889 = vmatprep.mubr.bf16.mxu1 %v2225_v2 }
 0x186   : > { %1774 = vmatmul.mubr.msk.bf16.vlgmr.msra.gmra.mrb[32].mxu0 %vm684_vm1, %v2458_v29 }
 0x187   : > { %942 = vmatprep.mubr.bf16.mxu0 %v2225_v2 }
 0x18c   : > { %1773 = vmatmul.mubr.msk.bf16.gmra.mrb[32].mxu1 %vm684_vm1, %v2054_v53 }
 0x18d   : > { %1105 = vmatprep.mubr.bf16.mxu1 %v2225_v2 }
 0x18e   : > { %1775 = vmatmul.mubr.msk.bf16.gmra.mrb[36].mxu0 %vm684_vm1, %v2045_v43 }
 0x18f   : > { %952 = vmatprep.mubr.bf16.mxu0 %v2225_v2 }
 0x194   : > { %1788 = vmatmul.mubr.msk.bf16.vlgmr.msra.gmra.mrb[36].mxu1 %vm684_vm1, %v2458_v29 }
 0x195   : > { %1115 = vmatprep.mubr.bf16.mxu1 %v2225_v2 }
 0x196   : > { %1776 = vmatmul.mubr.msk.bf16.gmra.mrb[40].mxu0 %vm684_vm1, %v2047_v45 }
 0x197   : > { %962 = vmatprep.mubr.bf16.mxu0 %v2225_v2 }
 0x19c   : > { %1789 = vmatmul.mubr.msk.bf16.gmra.mrb[40].mxu1 %vm684_vm1, %v2045_v43 }
 0x19d   : > { %1125 = vmatprep.mubr.bf16.mxu1 %v2225_v2 }
 0x19e   : > { %1777 = vmatmul.mubr.msk.bf16.gmra.mrb[44].mxu0 %vm684_vm1, %v2049_v47 }
 0x19f   : > { %972 = vmatprep.mubr.bf16.mxu0 %v2225_v2 }
 0x1a4   : > { %1790 = vmatmul.mubr.msk.bf16.gmra.mrb[44].mxu1 %vm684_vm1, %v2047_v45 }
 0x1a5   : > { %1135 = vmatprep.mubr.bf16.mxu1 %v2225_v2 }
 0x1a6   : > { %1778 = vmatmul.mubr.msk.bf16.gmra.mrb[48].mxu0 %vm684_vm1, %v2051_v49 }
 0x1a7   : > { %982 = vmatprep.mubr.bf16.mxu0 %v2225_v2 }
 0x1ac   : > { %1791 = vmatmul.mubr.msk.bf16.gmra.mrb[48].mxu1 %vm684_vm1, %v2049_v47 }
 0x1ad   : > { %1145 = vmatprep.mubr.bf16.mxu1 %v2225_v2 }
 0x1ae   : > { %1779 = vmatmul.mubr.msk.bf16.gmra.mrb[52].mxu0 %vm684_vm1, %v2053_v51 }
 0x1af   : > { %992 = vmatprep.mubr.bf16.mxu0 %v2225_v2 }
 0x1b4   : > { %1792 = vmatmul.mubr.msk.bf16.gmra.mrb[52].mxu1 %vm684_vm1, %v2051_v49 }
 0x1b5   : > { %1155 = vmatprep.mubr.bf16.mxu1 %v2225_v2 }
 0x1b6   : > { %1780 = vmatmul.mubr.msk.bf16.gmra.mrb[56].mxu0 %vm684_vm1, %v2453_v28 }
 0x1b7   : > { %1002 = vmatprep.mubr.bf16.mxu0 %v2225_v2 }
 0x1bc   : > { %1793 = vmatmul.mubr.msk.bf16.gmra.mrb[56].mxu1 %vm684_vm1, %v2053_v51 }
 0x1bd   : > { %1165 = vmatprep.mubr.bf16.mxu1 %v2225_v2 }
 0x1be   : > { %1781 = vmatmul.mubr.msk.bf16.gmra.mrb[60].mxu0 %vm684_vm1, %v2469_v39 }
 0x1bf   : > { %1012 = vmatprep.mubr.bf16.mxu0 %v2225_v2 }
 0x1c4   : > { %1794 = vmatmul.mubr.msk.bf16.gmra.mrb[60].mxu1 %vm684_vm1, %v2453_v28 }
 0x1c5   : > { %1175 = vmatprep.mubr.bf16.mxu1 %v2225_v2 }
 0x1c6   : > { %1782 = vmatmul.mubr.msk.bf16.gmra.mrb[64].mxu0 %vm684_vm1, %v2482_v44 }
 0x1c7   : > { %1022 = vmatprep.mubr.bf16.mxu0 %v2225_v2 }
 0x1cc   : > { %1795 = vmatmul.mubr.msk.bf16.gmra.mrb[64].mxu1 %vm684_vm1, %v2469_v39 }
 0x1cd   : > { %1185 = vmatprep.mubr.bf16.mxu1 %v2225_v2 }
 0x1ce   : > { %1783 = vmatmul.mubr.msk.bf16.gmra.mrb[68].mxu0 %vm684_vm1, %v2495_v46 }
 0x1cf   : > { %1032 = vmatprep.mubr.bf16.mxu0 %v2225_v2 }
 0x1d4   : > { %1796 = vmatmul.mubr.msk.bf16.gmra.mrb[68].mxu1 %vm684_vm1, %v2482_v44 }
 0x1d5   : > { %1195 = vmatprep.mubr.bf16.mxu1 %v2225_v2 }
 0x1d6   : > { %1784 = vmatmul.mubr.msk.bf16.gmra.mrb[72].mxu0 %vm684_vm1, %v2048_v48 }
 0x1d7   : > { %1042 = vmatprep.mubr.bf16.mxu0 %v2225_v2 }
 0x1dc   : > { %1797 = vmatmul.mubr.msk.bf16.gmra.mrb[72].mxu1 %vm684_vm1, %v2495_v46 }
 0x1dd   : > { %1205 = vmatprep.mubr.bf16.mxu1 %v2225_v2 }
 0x1de   : > { %1785 = vmatmul.mubr.msk.bf16.gmra.mrb[76].mxu0 %vm684_vm1, %v2050_v50 }
 0x1df   : > { %1052 = vmatprep.mubr.bf16.mxu0 %v2225_v2 }
 0x1e4   : > { %1798 = vmatmul.mubr.msk.bf16.gmra.mrb[76].mxu1 %vm684_vm1, %v2048_v48 }
 0x1e5   : > { %1215 = vmatprep.mubr.bf16.mxu1 %v2225_v2 }
 0x1e6   : > { %1786 = vmatmul.mubr.msk.bf16.gmra.mrb[80].mxu0 %vm684_vm1, %v2052_v52 }
 0x1e7   : > { %1062 = vmatprep.mubr.bf16.mxu0 %v2225_v2 }
 0x1ec   : > { %1799 = vmatmul.mubr.msk.bf16.gmra.mrb[80].mxu1 %vm684_vm1, %v2050_v50 }
 0x1ed   : > { %1225 = vmatprep.mubr.bf16.mxu1 %v2225_v2 }
 0x1ee   : > { %1787 = vmatmul.mubr.msk.bf16.gmra.mrb[84].mxu0 %vm684_vm1, %v2054_v53 }
 0x1f4   : > { %1800 = vmatmul.mubr.msk.bf16.gmra.mrb[84].mxu1 %vm684_vm1, %v2052_v52 }
 0x1f5   : > { %1235 = vmatprep.mubr.bf16.mxu1 %v2225_v2 }
 0x1fc   : > { %1801 = vmatmul.mubr.msk.bf16.gmra.mrb[88].mxu1 %vm684_vm1, %v2054_v53 }
 0x227   : > { %v821_v55 = vpop.f32.mrb[4].mxu1  ;;  %v761_v56 = vpop.f32.mrb[8].mxu0 }
 0x228   : > { %v1272_v57 = vadd.f32 %v2600_v54, %v821_v55  ;;  %v823_v58 = vpop.f32.mrb[5].mxu1  ;;  %v1248_v59 = vadd.f32 %v2600_v54, %v761_v56  ;;  %v763_v60 = vpop.f32.mrb[9].mxu0 }
 0x229   : > { %v1273_v61 = vadd.f32 %v2600_v54, %v823_v58  ;;  %v825_v62 = vpop.f32.mrb[6].mxu1  ;;  %v1249_v63 = vadd.f32 %v2600_v54, %v763_v60  ;;  %v765_v0 = vpop.f32.mrb[10].mxu0 }
 0x22a   : > { %1329 = vst [vmem:[%s2606_s24 + $0xc0] sm:$0xff] %v1272_v57  ;;  %v1274_v1 = vadd.f32 %v2600_v54, %v825_v62  ;;  %v827_v2 = vpop.f32.mrb[7].mxu1  ;;  %1304 = vst [vmem:[%s2606_s24] sm:$0xff] %v1248_v59  ;;  %v1250_v3 = vadd.f32 %v2600_v54, %v765_v0  ;;  %v767_v4 = vpop.f32.mrb[11].mxu0 }
 0x22b   : > { %1330 = vst.msk [vmem:[%s2606_s24 + $0xc8] sm:$0xff] %vm1305_vm2, %v1273_v61  ;;  %v1275_v5 = vadd.f32 %v2600_v54, %v827_v2  ;;  %1306 = vst.msk [vmem:[%s2606_s24 + $0x8] sm:$0xff] %vm1305_vm2, %v1249_v63  ;;  %v1251_v6 = vadd.f32 %v2600_v54, %v767_v4 }
 0x22c   : > { %1331 = vst [vmem:[%s2606_s24 + $0xd0] sm:$0xff] %v1274_v1  ;;  %1307 = vst [vmem:[%s2606_s24 + $0x10] sm:$0xff] %v1250_v3 }
 0x22d   : > { %1332 = vst.msk [vmem:[%s2606_s24 + $0xd8] sm:$0xff] %vm1305_vm2, %v1275_v5  ;;  %1308 = vst.msk [vmem:[%s2606_s24 + $0x18] sm:$0xff] %vm1305_vm2, %v1251_v6 }
 0x22f   : > { %v831_v7 = vpop.f32.mrb[8].mxu1 }
 0x230   : > { %v1276_v8 = vadd.f32 %v2600_v54, %v831_v7  ;;  %v833_v9 = vpop.f32.mrb[9].mxu1 }
 0x231   : > { %v1277_v10 = vadd.f32 %v2600_v54, %v833_v9  ;;  %v835_v11 = vpop.f32.mrb[10].mxu1  ;;  %v771_v12 = vpop.f32.mrb[12].mxu0 }
 0x232   : > { %1333 = vst [vmem:[%s2606_s24 + $0xe0] sm:$0xff] %v1276_v8  ;;  %v1278_v13 = vadd.f32 %v2600_v54, %v835_v11  ;;  %v837_v14 = vpop.f32.mrb[11].mxu1  ;;  %v1252_v15 = vadd.f32 %v2600_v54, %v771_v12  ;;  %v773_v16 = vpop.f32.mrb[13].mxu0 }
 0x233   : > { %1334 = vst.msk [vmem:[%s2606_s24 + $0xe8] sm:$0xff] %vm1305_vm2, %v1277_v10  ;;  %v1279_v17 = vadd.f32 %v2600_v54, %v837_v14  ;;  %v1253_v18 = vadd.f32 %v2600_v54, %v773_v16  ;;  %v775_v19 = vpop.f32.mrb[14].mxu0 }
 0x234   : > { %1335 = vst [vmem:[%s2606_s24 + $0xf0] sm:$0xff] %v1278_v13  ;;  %1309 = vst [vmem:[%s2606_s24 + $0x20] sm:$0xff] %v1252_v15  ;;  %v1254_v20 = vadd.f32 %v2600_v54, %v775_v19  ;;  %v777_v21 = vpop.f32.mrb[15].mxu0 }
 0x235   : > { %1336 = vst.msk [vmem:[%s2606_s24 + $0xf8] sm:$0xff] %vm1305_vm2, %v1279_v17  ;;  %1310 = vst.msk [vmem:[%s2606_s24 + $0x28] sm:$0xff] %vm1305_vm2, %v1253_v18  ;;  %v1255_v22 = vadd.f32 %v2600_v54, %v777_v21 }
 0x236   : > { %1311 = vst [vmem:[%s2606_s24 + $0x30] sm:$0xff] %v1254_v20 }
 0x237   : > { %v841_v23 = vpop.f32.mrb[12].mxu1  ;;  %1312 = vst.msk [vmem:[%s2606_s24 + $0x38] sm:$0xff] %vm1305_vm2, %v1255_v22 }
 0x238   : > { %v1280_v24 = vadd.f32 %v2600_v54, %v841_v23  ;;  %v843_v25 = vpop.f32.mrb[13].mxu1 }
 0x239   : > { %v1281_v26 = vadd.f32 %v2600_v54, %v843_v25  ;;  %v845_v27 = vpop.f32.mrb[14].mxu1  ;;  %v781_v28 = vpop.f32.mrb[16].mxu0  ;;  %v2724_v25 = vstv %s1802_s25 }
 0x23a   : > { %1337 = vst [vmem:[%s2606_s24 + $0x100] sm:$0xff] %v1280_v24  ;;  %v1282_v29 = vadd.f32 %v2600_v54, %v845_v27  ;;  %v847_v30 = vpop.f32.mrb[15].mxu1  ;;  %v1256_v31 = vadd.f32 %v2600_v54, %v781_v28  ;;  %v783_v32 = vpop.f32.mrb[17].mxu0 }
 0x23b   : > { %1338 = vst.msk [vmem:[%s2606_s24 + $0x108] sm:$0xff] %vm1305_vm2, %v1281_v26  ;;  %v1283_v33 = vadd.f32 %v2600_v54, %v847_v30  ;;  %v1257_v34 = vadd.f32 %v2600_v54, %v783_v32  ;;  %v785_v35 = vpop.f32.mrb[18].mxu0 }
 0x23c   : > { %1339 = vst [vmem:[%s2606_s24 + $0x110] sm:$0xff] %v1282_v29  ;;  %1313 = vst [vmem:[%s2606_s24 + $0x40] sm:$0xff] %v1256_v31  ;;  %v1258_v36 = vadd.f32 %v2600_v54, %v785_v35  ;;  %v787_v37 = vpop.f32.mrb[19].mxu0 }
 0x23d   : > { %1340 = vst.msk [vmem:[%s2606_s24 + $0x118] sm:$0xff] %vm1305_vm2, %v1283_v33  ;;  %1314 = vst.msk [vmem:[%s2606_s24 + $0x48] sm:$0xff] %vm1305_vm2, %v1257_v34  ;;  %v1259_v38 = vadd.f32 %v2600_v54, %v787_v37 }
 0x23e   : > { %1315 = vst [vmem:[%s2606_s24 + $0x50] sm:$0xff] %v1258_v36 }
 0x23f   : > { %v851_v39 = vpop.f32.mrb[16].mxu1  ;;  %1316 = vst.msk [vmem:[%s2606_s24 + $0x58] sm:$0xff] %vm1305_vm2, %v1259_v38 }
 0x240   : > { %v1284_v40 = vadd.f32 %v2600_v54, %v851_v39  ;;  %v853_v41 = vpop.f32.mrb[17].mxu1 }
 0x241   : > { %v1285_v42 = vadd.f32 %v2600_v54, %v853_v41  ;;  %v855_v43 = vpop.f32.mrb[18].mxu1  ;;  %v791_v44 = vpop.f32.mrb[20].mxu0 }
 0x242   : > { %1341 = vst [vmem:[%s2606_s24 + $0x120] sm:$0xff] %v1284_v40  ;;  %v1286_v45 = vadd.f32 %v2600_v54, %v855_v43  ;;  %v857_v46 = vpop.f32.mrb[19].mxu1  ;;  %v1260_v47 = vadd.f32 %v2600_v54, %v791_v44  ;;  %v793_v48 = vpop.f32.mrb[21].mxu0 }
 0x243   : > { %1342 = vst.msk [vmem:[%s2606_s24 + $0x128] sm:$0xff] %vm1305_vm2, %v1285_v42  ;;  %v1287_v49 = vadd.f32 %v2600_v54, %v857_v46  ;;  %v1261_v50 = vadd.f32 %v2600_v54, %v793_v48  ;;  %v795_v51 = vpop.f32.mrb[22].mxu0 }
 0x244   : > { %1343 = vst [vmem:[%s2606_s24 + $0x130] sm:$0xff] %v1286_v45  ;;  %1317 = vst [vmem:[%s2606_s24 + $0x60] sm:$0xff] %v1260_v47  ;;  %v1262_v52 = vadd.f32 %v2600_v54, %v795_v51  ;;  %v797_v53 = vpop.f32.mrb[23].mxu0 }
 0x245   : > { %1344 = vst.msk [vmem:[%s2606_s24 + $0x138] sm:$0xff] %vm1305_vm2, %v1287_v49  ;;  %1318 = vst.msk [vmem:[%s2606_s24 + $0x68] sm:$0xff] %vm1305_vm2, %v1261_v50  ;;  %v1263_v55 = vadd.f32 %v2600_v54, %v797_v53 }
 0x246   : > { %1319 = vst [vmem:[%s2606_s24 + $0x70] sm:$0xff] %v1262_v52 }
 0x247   : > { %v861_v56 = vpop.f32.mrb[20].mxu1  ;;  %1320 = vst.msk [vmem:[%s2606_s24 + $0x78] sm:$0xff] %vm1305_vm2, %v1263_v55 }
 0x248   : > { %v1288_v57 = vadd.f32 %v2600_v54, %v861_v56  ;;  %v863_v58 = vpop.f32.mrb[21].mxu1 }
 0x249   : > { %v1289_v59 = vadd.f32 %v2600_v54, %v863_v58  ;;  %v865_v60 = vpop.f32.mrb[22].mxu1  ;;  %v801_v61 = vpop.f32.mrb[24].mxu0 }
 0x24a   : > { %1345 = vst [vmem:[%s2606_s24 + $0x140] sm:$0xff] %v1288_v57  ;;  %v1290_v62 = vadd.f32 %v2600_v54, %v865_v60  ;;  %v867_v63 = vpop.f32.mrb[23].mxu1  ;;  %v1264_v0 = vadd.f32 %v2600_v54, %v801_v61  ;;  %v803_v1 = vpop.f32.mrb[25].mxu0  ;;  %v2760_v57 = vstv %s1859_s28 }
 0x24b   : > { %1346 = vst.msk [vmem:[%s2606_s24 + $0x148] sm:$0xff] %vm1305_vm2, %v1289_v59  ;;  %v1291_v2 = vadd.f32 %v2600_v54, %v867_v63  ;;  %v1265_v3 = vadd.f32 %v2600_v54, %v803_v1  ;;  %v805_v4 = vpop.f32.mrb[26].mxu0 }
 0x24c   : > { %1347 = vst [vmem:[%s2606_s24 + $0x150] sm:$0xff] %v1290_v62  ;;  %1321 = vst [vmem:[%s2606_s24 + $0x80] sm:$0xff] %v1264_v0  ;;  %v1266_v5 = vadd.f32 %v2600_v54, %v805_v4  ;;  %v807_v6 = vpop.f32.mrb[27].mxu0 }
 0x24d   : > { %1348 = vst.msk [vmem:[%s2606_s24 + $0x158] sm:$0xff] %vm1305_vm2, %v1291_v2  ;;  %1322 = vst.msk [vmem:[%s2606_s24 + $0x88] sm:$0xff] %vm1305_vm2, %v1265_v3  ;;  %v1267_v7 = vadd.f32 %v2600_v54, %v807_v6 }
 0x24e   : > { %1323 = vst [vmem:[%s2606_s24 + $0x90] sm:$0xff] %v1266_v5 }
 0x24f   : > { %v871_v8 = vpop.f32.mrb[24].mxu1  ;;  %1324 = vst.msk [vmem:[%s2606_s24 + $0x98] sm:$0xff] %vm1305_vm2, %v1267_v7 }
 0x250   : > { %v1292_v9 = vadd.f32 %v2600_v54, %v871_v8  ;;  %v873_v10 = vpop.f32.mrb[25].mxu1 }
 0x251   : > { %v1293_v11 = vadd.f32 %v2600_v54, %v873_v10  ;;  %v875_v12 = vpop.f32.mrb[26].mxu1  ;;  %v811_v13 = vpop.f32.mrb[28].mxu0 }
 0x252   : > { %1349 = vst [vmem:[%s2606_s24 + $0x160] sm:$0xff] %v1292_v9  ;;  %v1294_v14 = vadd.f32 %v2600_v54, %v875_v12  ;;  %v877_v15 = vpop.f32.mrb[27].mxu1  ;;  %v1268_v16 = vadd.f32 %v2600_v54, %v811_v13  ;;  %v813_v17 = vpop.f32.mrb[29].mxu0 }
 0x253   : > { %1350 = vst.msk [vmem:[%s2606_s24 + $0x168] sm:$0xff] %vm1305_vm2, %v1293_v11  ;;  %v1295_v18 = vadd.f32 %v2600_v54, %v877_v15  ;;  %v1269_v19 = vadd.f32 %v2600_v54, %v813_v17  ;;  %v815_v20 = vpop.f32.mrb[30].mxu0 }
 0x254   : > { %1351 = vst [vmem:[%s2606_s24 + $0x170] sm:$0xff] %v1294_v14  ;;  %1325 = vst [vmem:[%s2606_s24 + $0xa0] sm:$0xff] %v1268_v16  ;;  %v1270_v21 = vadd.f32 %v2600_v54, %v815_v20  ;;  %v817_v22 = vpop.f32.mrb[31].mxu0 }
 0x255   : > { %1352 = vst.msk [vmem:[%s2606_s24 + $0x178] sm:$0xff] %vm1305_vm2, %v1295_v18  ;;  %1326 = vst.msk [vmem:[%s2606_s24 + $0xa8] sm:$0xff] %vm1305_vm2, %v1269_v19  ;;  %v1271_v23 = vadd.f32 %v2600_v54, %v817_v22 }
 0x256   : > { %1327 = vst [vmem:[%s2606_s24 + $0xb0] sm:$0xff] %v1270_v21 }
 0x257   : > { %v881_v24 = vpop.f32.mrb[28].mxu1  ;;  %1328 = vst.msk [vmem:[%s2606_s24 + $0xb8] sm:$0xff] %vm1305_vm2, %v1271_v23 }
 0x258   : > { %v1296_v26 = vadd.f32 %v2600_v54, %v881_v24  ;;  %v883_v27 = vpop.f32.mrb[29].mxu1 }
 0x259   : > { %v1297_v28 = vadd.f32 %v2600_v54, %v883_v27  ;;  %v885_v29 = vpop.f32.mrb[30].mxu1  ;;  %v934_v30 = vpop.f32.mrb[32].mxu0 }
 0x25a   : > { %1353 = vst [vmem:[%s2606_s24 + $0x180] sm:$0xff] %v1296_v26  ;;  %v1298_v31 = vadd.f32 %v2600_v54, %v885_v29  ;;  %v887_v32 = vpop.f32.mrb[31].mxu1  ;;  %v1363_v33 = vadd.f32 %v2724_v25, %v934_v30  ;;  %v936_v34 = vpop.f32.mrb[33].mxu0 }
 0x25b   : > { %1354 = vst.msk [vmem:[%s2606_s24 + $0x188] sm:$0xff] %vm1305_vm2, %v1297_v28  ;;  %v1299_v35 = vadd.f32 %v2600_v54, %v887_v32  ;;  %v1364_v36 = vadd.f32 %v2724_v25, %v936_v34  ;;  %v938_v37 = vpop.f32.mrb[34].mxu0 }
 0x25c   : > { %1355 = vst [vmem:[%s2606_s24 + $0x190] sm:$0xff] %v1298_v31  ;;  %1803 = vst [vmem:[%s2606_s24 + $0x1c0] sm:$0xff] %v1363_v33  ;;  %v1365_v38 = vadd.f32 %v2724_v25, %v938_v37  ;;  %v940_v39 = vpop.f32.mrb[35].mxu0 }
 0x25d   : > { %1356 = vst.msk [vmem:[%s2606_s24 + $0x198] sm:$0xff] %vm1305_vm2, %v1299_v35  ;;  %1804 = vst.msk [vmem:[%s2606_s24 + $0x1c8] sm:$0xff] %vm1305_vm2, %v1364_v36  ;;  %v1366_v40 = vadd.f32 %v2724_v25, %v940_v39 }
 0x25e   : > { %1805 = vst [vmem:[%s2606_s24 + $0x1d0] sm:$0xff] %v1365_v38 }
 0x25f   : > { %v891_v41 = vpop.f32.mrb[32].mxu1  ;;  %1806 = vst.msk [vmem:[%s2606_s24 + $0x1d8] sm:$0xff] %vm1305_vm2, %v1366_v40 }
 0x260   : > { %v1300_v42 = vadd.f32 %v2600_v54, %v891_v41  ;;  %v893_v43 = vpop.f32.mrb[33].mxu1 }
 0x261   : > { %v1301_v44 = vadd.f32 %v2600_v54, %v893_v43  ;;  %v895_v45 = vpop.f32.mrb[34].mxu1  ;;  %v944_v46 = vpop.f32.mrb[36].mxu0 }
 0x262   : > { %1357 = vst [vmem:[%s2606_s24 + $0x1a0] sm:$0xff] %v1300_v42  ;;  %v1302_v47 = vadd.f32 %v2600_v54, %v895_v45  ;;  %v897_v48 = vpop.f32.mrb[35].mxu1  ;;  %v1367_v49 = vadd.f32 %v2724_v25, %v944_v46  ;;  %v946_v50 = vpop.f32.mrb[37].mxu0 }
 0x263   : > { %1358 = vst.msk [vmem:[%s2606_s24 + $0x1a8] sm:$0xff] %vm1305_vm2, %v1301_v44  ;;  %v1303_v51 = vadd.f32 %v2600_v54, %v897_v48  ;;  %v1368_v52 = vadd.f32 %v2724_v25, %v946_v50  ;;  %v948_v53 = vpop.f32.mrb[38].mxu0 }
 0x264   : > { %1359 = vst [vmem:[%s2606_s24 + $0x1b0] sm:$0xff] %v1302_v47  ;;  %1807 = vst [vmem:[%s2606_s24 + $0x1e0] sm:$0xff] %v1367_v49  ;;  %v1369_v55 = vadd.f32 %v2724_v25, %v948_v53  ;;  %v950_v56 = vpop.f32.mrb[39].mxu0 }
 0x265   : > { %1360 = vst.msk [vmem:[%s2606_s24 + $0x1b8] sm:$0xff] %vm1305_vm2, %v1303_v51  ;;  %1808 = vst.msk [vmem:[%s2606_s24 + $0x1e8] sm:$0xff] %vm1305_vm2, %v1368_v52  ;;  %v1370_v58 = vadd.f32 %v2724_v25, %v950_v56 }
 0x266   : > { %1809 = vst [vmem:[%s2606_s24 + $0x1f0] sm:$0xff] %v1369_v55 }
 0x267   : > { %v1107_v54 = vpop.f32.mrb[36].mxu1  ;;  %1810 = vst.msk [vmem:[%s2606_s24 + $0x1f8] sm:$0xff] %vm1305_vm2, %v1370_v58 }
 0x268   : > { %v1478_v59 = vadd.f32 %v2760_v57, %v1107_v54  ;;  %v1109_v60 = vpop.f32.mrb[37].mxu1 }
 0x269   : > { %v1479_v61 = vadd.f32 %v2760_v57, %v1109_v60  ;;  %v1111_v62 = vpop.f32.mrb[38].mxu1  ;;  %v954_v63 = vpop.f32.mrb[40].mxu0 }
 0x26a   : > { %1860 = vst [vmem:[%s2606_s24 + $0x380] sm:$0xff] %v1478_v59  ;;  %v1480_v0 = vadd.f32 %v2760_v57, %v1111_v62  ;;  %v1113_v1 = vpop.f32.mrb[39].mxu1  ;;  %v1371_v2 = vadd.f32 %v2724_v25, %v954_v63  ;;  %v956_v3 = vpop.f32.mrb[41].mxu0 }
 0x26b   : > { %1861 = vst.msk [vmem:[%s2606_s24 + $0x388] sm:$0xff] %vm1305_vm2, %v1479_v61  ;;  %v1481_v4 = vadd.f32 %v2760_v57, %v1113_v1  ;;  %v1372_v5 = vadd.f32 %v2724_v25, %v956_v3  ;;  %v958_v6 = vpop.f32.mrb[42].mxu0 }
 0x26c   : > { %1862 = vst [vmem:[%s2606_s24 + $0x390] sm:$0xff] %v1480_v0  ;;  %1811 = vst [vmem:[%s2606_s24 + $0x200] sm:$0xff] %v1371_v2  ;;  %v1373_v7 = vadd.f32 %v2724_v25, %v958_v6  ;;  %v960_v8 = vpop.f32.mrb[43].mxu0 }
 0x26d   : > { %1863 = vst.msk [vmem:[%s2606_s24 + $0x398] sm:$0xff] %vm1305_vm2, %v1481_v4  ;;  %1812 = vst.msk [vmem:[%s2606_s24 + $0x208] sm:$0xff] %vm1305_vm2, %v1372_v5  ;;  %v1374_v9 = vadd.f32 %v2724_v25, %v960_v8 }
 0x26e   : > { %1813 = vst [vmem:[%s2606_s24 + $0x210] sm:$0xff] %v1373_v7 }
 0x26f   : > { %v1117_v10 = vpop.f32.mrb[40].mxu1  ;;  %1814 = vst.msk [vmem:[%s2606_s24 + $0x218] sm:$0xff] %vm1305_vm2, %v1374_v9 }
 0x270   : > { %v1482_v11 = vadd.f32 %v2760_v57, %v1117_v10  ;;  %v1119_v12 = vpop.f32.mrb[41].mxu1 }
 0x271   : > { %v1483_v13 = vadd.f32 %v2760_v57, %v1119_v12  ;;  %v1121_v14 = vpop.f32.mrb[42].mxu1  ;;  %v964_v15 = vpop.f32.mrb[44].mxu0 }
 0x272   : > { %1864 = vst [vmem:[%s2606_s24 + $0x3a0] sm:$0xff] %v1482_v11  ;;  %v1484_v16 = vadd.f32 %v2760_v57, %v1121_v14  ;;  %v1123_v17 = vpop.f32.mrb[43].mxu1  ;;  %v1375_v18 = vadd.f32 %v2724_v25, %v964_v15  ;;  %v966_v19 = vpop.f32.mrb[45].mxu0 }
 0x273   : > { %1865 = vst.msk [vmem:[%s2606_s24 + $0x3a8] sm:$0xff] %vm1305_vm2, %v1483_v13  ;;  %v1485_v20 = vadd.f32 %v2760_v57, %v1123_v17  ;;  %v1376_v21 = vadd.f32 %v2724_v25, %v966_v19  ;;  %v968_v22 = vpop.f32.mrb[46].mxu0 }
 0x274   : > { %1866 = vst [vmem:[%s2606_s24 + $0x3b0] sm:$0xff] %v1484_v16  ;;  %1815 = vst [vmem:[%s2606_s24 + $0x220] sm:$0xff] %v1375_v18  ;;  %v1377_v23 = vadd.f32 %v2724_v25, %v968_v22  ;;  %v970_v24 = vpop.f32.mrb[47].mxu0 }
 0x275   : > { %1867 = vst.msk [vmem:[%s2606_s24 + $0x3b8] sm:$0xff] %vm1305_vm2, %v1485_v20  ;;  %1816 = vst.msk [vmem:[%s2606_s24 + $0x228] sm:$0xff] %vm1305_vm2, %v1376_v21  ;;  %v1378_v26 = vadd.f32 %v2724_v25, %v970_v24 }
 0x276   : > { %1817 = vst [vmem:[%s2606_s24 + $0x230] sm:$0xff] %v1377_v23 }
 0x277   : > { %v1127_v27 = vpop.f32.mrb[44].mxu1  ;;  %1818 = vst.msk [vmem:[%s2606_s24 + $0x238] sm:$0xff] %vm1305_vm2, %v1378_v26 }
 0x278   : > { %v1486_v28 = vadd.f32 %v2760_v57, %v1127_v27  ;;  %v1129_v29 = vpop.f32.mrb[45].mxu1 }
 0x279   : > { %v1487_v30 = vadd.f32 %v2760_v57, %v1129_v29  ;;  %v1131_v31 = vpop.f32.mrb[46].mxu1  ;;  %v974_v32 = vpop.f32.mrb[48].mxu0 }
 0x27a   : > { %1868 = vst [vmem:[%s2606_s24 + $0x3c0] sm:$0xff] %v1486_v28  ;;  %v1488_v33 = vadd.f32 %v2760_v57, %v1131_v31  ;;  %v1133_v34 = vpop.f32.mrb[47].mxu1  ;;  %v1379_v35 = vadd.f32 %v2724_v25, %v974_v32  ;;  %v976_v36 = vpop.f32.mrb[49].mxu0 }
 0x27b   : > { %1869 = vst.msk [vmem:[%s2606_s24 + $0x3c8] sm:$0xff] %vm1305_vm2, %v1487_v30  ;;  %v1489_v37 = vadd.f32 %v2760_v57, %v1133_v34  ;;  %v1380_v38 = vadd.f32 %v2724_v25, %v976_v36  ;;  %v978_v39 = vpop.f32.mrb[50].mxu0 }
 0x27c   : > { %1870 = vst [vmem:[%s2606_s24 + $0x3d0] sm:$0xff] %v1488_v33  ;;  %1819 = vst [vmem:[%s2606_s24 + $0x240] sm:$0xff] %v1379_v35  ;;  %v1381_v40 = vadd.f32 %v2724_v25, %v978_v39  ;;  %v980_v41 = vpop.f32.mrb[51].mxu0 }
 0x27d   : > { %1871 = vst.msk [vmem:[%s2606_s24 + $0x3d8] sm:$0xff] %vm1305_vm2, %v1489_v37  ;;  %1820 = vst.msk [vmem:[%s2606_s24 + $0x248] sm:$0xff] %vm1305_vm2, %v1380_v38  ;;  %v1382_v42 = vadd.f32 %v2724_v25, %v980_v41 }
 0x27e   : > { %1821 = vst [vmem:[%s2606_s24 + $0x250] sm:$0xff] %v1381_v40 }
 0x27f   : > { %v1137_v43 = vpop.f32.mrb[48].mxu1  ;;  %1822 = vst.msk [vmem:[%s2606_s24 + $0x258] sm:$0xff] %vm1305_vm2, %v1382_v42 }
 0x280   : > { %v1490_v44 = vadd.f32 %v2760_v57, %v1137_v43  ;;  %v1139_v45 = vpop.f32.mrb[49].mxu1 }
 0x281   : > { %v1491_v46 = vadd.f32 %v2760_v57, %v1139_v45  ;;  %v1141_v47 = vpop.f32.mrb[50].mxu1  ;;  %v984_v48 = vpop.f32.mrb[52].mxu0 }
 0x282   : > { %1872 = vst [vmem:[%s2606_s24 + $0x3e0] sm:$0xff] %v1490_v44  ;;  %v1492_v49 = vadd.f32 %v2760_v57, %v1141_v47  ;;  %v1143_v50 = vpop.f32.mrb[51].mxu1  ;;  %v1383_v51 = vadd.f32 %v2724_v25, %v984_v48  ;;  %v986_v52 = vpop.f32.mrb[53].mxu0 }
 0x283   : > { %1873 = vst.msk [vmem:[%s2606_s24 + $0x3e8] sm:$0xff] %vm1305_vm2, %v1491_v46  ;;  %v1493_v53 = vadd.f32 %v2760_v57, %v1143_v50  ;;  %v1384_v55 = vadd.f32 %v2724_v25, %v986_v52  ;;  %v988_v56 = vpop.f32.mrb[54].mxu0 }
 0x284   : > { %1874 = vst [vmem:[%s2606_s24 + $0x3f0] sm:$0xff] %v1492_v49  ;;  %1823 = vst [vmem:[%s2606_s24 + $0x260] sm:$0xff] %v1383_v51  ;;  %v1385_v58 = vadd.f32 %v2724_v25, %v988_v56  ;;  %v990_v54 = vpop.f32.mrb[55].mxu0 }
 0x285   : > { %1875 = vst.msk [vmem:[%s2606_s24 + $0x3f8] sm:$0xff] %vm1305_vm2, %v1493_v53  ;;  %1824 = vst.msk [vmem:[%s2606_s24 + $0x268] sm:$0xff] %vm1305_vm2, %v1384_v55  ;;  %v1386_v59 = vadd.f32 %v2724_v25, %v990_v54 }
 0x286   : > { %1825 = vst [vmem:[%s2606_s24 + $0x270] sm:$0xff] %v1385_v58 }
 0x287   : > { %v1147_v60 = vpop.f32.mrb[52].mxu1  ;;  %1826 = vst.msk [vmem:[%s2606_s24 + $0x278] sm:$0xff] %vm1305_vm2, %v1386_v59 }
 0x288   : > { %v1494_v61 = vadd.f32 %v2760_v57, %v1147_v60  ;;  %v1149_v62 = vpop.f32.mrb[53].mxu1 }
 0x289   : > { %v1495_v63 = vadd.f32 %v2760_v57, %v1149_v62  ;;  %v1151_v0 = vpop.f32.mrb[54].mxu1  ;;  %v994_v1 = vpop.f32.mrb[56].mxu0 }
 0x28a   : > { %1876 = vst [vmem:[%s2606_s24 + $0x400] sm:$0xff] %v1494_v61  ;;  %v1496_v2 = vadd.f32 %v2760_v57, %v1151_v0  ;;  %v1153_v3 = vpop.f32.mrb[55].mxu1  ;;  %v1387_v4 = vadd.f32 %v2724_v25, %v994_v1  ;;  %v996_v5 = vpop.f32.mrb[57].mxu0 }
 0x28b   : > { %1877 = vst.msk [vmem:[%s2606_s24 + $0x408] sm:$0xff] %vm1305_vm2, %v1495_v63  ;;  %v1497_v6 = vadd.f32 %v2760_v57, %v1153_v3  ;;  %v1388_v7 = vadd.f32 %v2724_v25, %v996_v5  ;;  %v998_v8 = vpop.f32.mrb[58].mxu0 }
 0x28c   : > { %1878 = vst [vmem:[%s2606_s24 + $0x410] sm:$0xff] %v1496_v2  ;;  %1827 = vst [vmem:[%s2606_s24 + $0x280] sm:$0xff] %v1387_v4  ;;  %v1389_v9 = vadd.f32 %v2724_v25, %v998_v8  ;;  %v1000_v10 = vpop.f32.mrb[59].mxu0 }
 0x28d   : > { %1879 = vst.msk [vmem:[%s2606_s24 + $0x418] sm:$0xff] %vm1305_vm2, %v1497_v6  ;;  %1828 = vst.msk [vmem:[%s2606_s24 + $0x288] sm:$0xff] %vm1305_vm2, %v1388_v7  ;;  %v1390_v11 = vadd.f32 %v2724_v25, %v1000_v10 }
 0x28e   : > { %1829 = vst [vmem:[%s2606_s24 + $0x290] sm:$0xff] %v1389_v9 }
 0x28f   : > { %v1157_v12 = vpop.f32.mrb[56].mxu1  ;;  %1830 = vst.msk [vmem:[%s2606_s24 + $0x298] sm:$0xff] %vm1305_vm2, %v1390_v11 }
 0x290   : > { %v1498_v13 = vadd.f32 %v2760_v57, %v1157_v12  ;;  %v1159_v14 = vpop.f32.mrb[57].mxu1 }
 0x291   : > { %v1499_v15 = vadd.f32 %v2760_v57, %v1159_v14  ;;  %v1161_v16 = vpop.f32.mrb[58].mxu1  ;;  %v1004_v17 = vpop.f32.mrb[60].mxu0 }
 0x292   : > { %1880 = vst [vmem:[%s2606_s24 + $0x420] sm:$0xff] %v1498_v13  ;;  %v1500_v18 = vadd.f32 %v2760_v57, %v1161_v16  ;;  %v1163_v19 = vpop.f32.mrb[59].mxu1  ;;  %v1391_v20 = vadd.f32 %v2724_v25, %v1004_v17  ;;  %v1006_v21 = vpop.f32.mrb[61].mxu0 }
 0x293   : > { %1881 = vst.msk [vmem:[%s2606_s24 + $0x428] sm:$0xff] %vm1305_vm2, %v1499_v15  ;;  %v1501_v22 = vadd.f32 %v2760_v57, %v1163_v19  ;;  %v1392_v23 = vadd.f32 %v2724_v25, %v1006_v21  ;;  %v1008_v24 = vpop.f32.mrb[62].mxu0 }
 0x294   : > { %1882 = vst [vmem:[%s2606_s24 + $0x430] sm:$0xff] %v1500_v18  ;;  %1831 = vst [vmem:[%s2606_s24 + $0x2a0] sm:$0xff] %v1391_v20  ;;  %v1393_v26 = vadd.f32 %v2724_v25, %v1008_v24  ;;  %v1010_v27 = vpop.f32.mrb[63].mxu0 }
 0x295   : > { %1883 = vst.msk [vmem:[%s2606_s24 + $0x438] sm:$0xff] %vm1305_vm2, %v1501_v22  ;;  %1832 = vst.msk [vmem:[%s2606_s24 + $0x2a8] sm:$0xff] %vm1305_vm2, %v1392_v23  ;;  %v1394_v28 = vadd.f32 %v2724_v25, %v1010_v27 }
 0x296   : > { %1833 = vst [vmem:[%s2606_s24 + $0x2b0] sm:$0xff] %v1393_v26 }
 0x297   : > { %v1167_v29 = vpop.f32.mrb[60].mxu1  ;;  %1834 = vst.msk [vmem:[%s2606_s24 + $0x2b8] sm:$0xff] %vm1305_vm2, %v1394_v28 }
 0x298   : > { %v1502_v30 = vadd.f32 %v2760_v57, %v1167_v29  ;;  %v1169_v31 = vpop.f32.mrb[61].mxu1 }
 0x299   : > { %v1503_v32 = vadd.f32 %v2760_v57, %v1169_v31  ;;  %v1171_v33 = vpop.f32.mrb[62].mxu1  ;;  %v1014_v34 = vpop.f32.mrb[64].mxu0 }
 0x29a   : > { %1884 = vst [vmem:[%s2606_s24 + $0x440] sm:$0xff] %v1502_v30  ;;  %v1504_v35 = vadd.f32 %v2760_v57, %v1171_v33  ;;  %v1173_v36 = vpop.f32.mrb[63].mxu1  ;;  %v1395_v37 = vadd.f32 %v2724_v25, %v1014_v34  ;;  %v1016_v38 = vpop.f32.mrb[65].mxu0 }
 0x29b   : > { %1885 = vst.msk [vmem:[%s2606_s24 + $0x448] sm:$0xff] %vm1305_vm2, %v1503_v32  ;;  %v1505_v39 = vadd.f32 %v2760_v57, %v1173_v36  ;;  %v1396_v40 = vadd.f32 %v2724_v25, %v1016_v38  ;;  %v1018_v41 = vpop.f32.mrb[66].mxu0 }
 0x29c   : > { %1886 = vst [vmem:[%s2606_s24 + $0x450] sm:$0xff] %v1504_v35  ;;  %1835 = vst [vmem:[%s2606_s24 + $0x2c0] sm:$0xff] %v1395_v37  ;;  %v1397_v42 = vadd.f32 %v2724_v25, %v1018_v41  ;;  %v1020_v43 = vpop.f32.mrb[67].mxu0 }
 0x29d   : > { %1887 = vst.msk [vmem:[%s2606_s24 + $0x458] sm:$0xff] %vm1305_vm2, %v1505_v39  ;;  %1836 = vst.msk [vmem:[%s2606_s24 + $0x2c8] sm:$0xff] %vm1305_vm2, %v1396_v40  ;;  %v1398_v44 = vadd.f32 %v2724_v25, %v1020_v43 }
 0x29e   : > { %1837 = vst [vmem:[%s2606_s24 + $0x2d0] sm:$0xff] %v1397_v42 }
 0x29f   : > { %v1177_v45 = vpop.f32.mrb[64].mxu1  ;;  %1838 = vst.msk [vmem:[%s2606_s24 + $0x2d8] sm:$0xff] %vm1305_vm2, %v1398_v44 }
 0x2a0   : > { %v1506_v46 = vadd.f32 %v2760_v57, %v1177_v45  ;;  %v1179_v47 = vpop.f32.mrb[65].mxu1 }
 0x2a1   : > { %v1507_v48 = vadd.f32 %v2760_v57, %v1179_v47  ;;  %v1181_v49 = vpop.f32.mrb[66].mxu1  ;;  %v1024_v50 = vpop.f32.mrb[68].mxu0 }
 0x2a2   : > { %1888 = vst [vmem:[%s2606_s24 + $0x460] sm:$0xff] %v1506_v46  ;;  %v1508_v51 = vadd.f32 %v2760_v57, %v1181_v49  ;;  %v1183_v52 = vpop.f32.mrb[67].mxu1  ;;  %v1399_v53 = vadd.f32 %v2724_v25, %v1024_v50  ;;  %v1026_v55 = vpop.f32.mrb[69].mxu0 }
 0x2a3   : > { %1889 = vst.msk [vmem:[%s2606_s24 + $0x468] sm:$0xff] %vm1305_vm2, %v1507_v48  ;;  %v1509_v56 = vadd.f32 %v2760_v57, %v1183_v52  ;;  %v1400_v58 = vadd.f32 %v2724_v25, %v1026_v55  ;;  %v1028_v54 = vpop.f32.mrb[70].mxu0 }
 0x2a4   : > { %1890 = vst [vmem:[%s2606_s24 + $0x470] sm:$0xff] %v1508_v51  ;;  %1839 = vst [vmem:[%s2606_s24 + $0x2e0] sm:$0xff] %v1399_v53  ;;  %v1401_v59 = vadd.f32 %v2724_v25, %v1028_v54  ;;  %v1030_v60 = vpop.f32.mrb[71].mxu0 }
 0x2a5   : > { %1891 = vst.msk [vmem:[%s2606_s24 + $0x478] sm:$0xff] %vm1305_vm2, %v1509_v56  ;;  %1840 = vst.msk [vmem:[%s2606_s24 + $0x2e8] sm:$0xff] %vm1305_vm2, %v1400_v58  ;;  %v1402_v61 = vadd.f32 %v2724_v25, %v1030_v60 }
 0x2a6   : > { %1841 = vst [vmem:[%s2606_s24 + $0x2f0] sm:$0xff] %v1401_v59 }
 0x2a7   : > { %v1187_v62 = vpop.f32.mrb[68].mxu1  ;;  %1842 = vst.msk [vmem:[%s2606_s24 + $0x2f8] sm:$0xff] %vm1305_vm2, %v1402_v61 }
 0x2a8   : > { %v1510_v63 = vadd.f32 %v2760_v57, %v1187_v62  ;;  %v1189_v0 = vpop.f32.mrb[69].mxu1 }
 0x2a9   : > { %v1511_v1 = vadd.f32 %v2760_v57, %v1189_v0  ;;  %v1191_v2 = vpop.f32.mrb[70].mxu1  ;;  %v1034_v3 = vpop.f32.mrb[72].mxu0 }
 0x2aa   : > { %1892 = vst [vmem:[%s2606_s24 + $0x480] sm:$0xff] %v1510_v63  ;;  %v1512_v4 = vadd.f32 %v2760_v57, %v1191_v2  ;;  %v1193_v5 = vpop.f32.mrb[71].mxu1  ;;  %v1403_v6 = vadd.f32 %v2724_v25, %v1034_v3  ;;  %v1036_v7 = vpop.f32.mrb[73].mxu0 }
 0x2ab   : > { %1893 = vst.msk [vmem:[%s2606_s24 + $0x488] sm:$0xff] %vm1305_vm2, %v1511_v1  ;;  %v1513_v8 = vadd.f32 %v2760_v57, %v1193_v5  ;;  %v1404_v9 = vadd.f32 %v2724_v25, %v1036_v7  ;;  %v1038_v10 = vpop.f32.mrb[74].mxu0 }
 0x2ac   : > { %1894 = vst [vmem:[%s2606_s24 + $0x490] sm:$0xff] %v1512_v4  ;;  %1843 = vst [vmem:[%s2606_s24 + $0x300] sm:$0xff] %v1403_v6  ;;  %v1405_v11 = vadd.f32 %v2724_v25, %v1038_v10  ;;  %v1040_v12 = vpop.f32.mrb[75].mxu0 }
 0x2ad   : > { %1895 = vst.msk [vmem:[%s2606_s24 + $0x498] sm:$0xff] %vm1305_vm2, %v1513_v8  ;;  %1844 = vst.msk [vmem:[%s2606_s24 + $0x308] sm:$0xff] %vm1305_vm2, %v1404_v9  ;;  %v1406_v13 = vadd.f32 %v2724_v25, %v1040_v12 }
 0x2ae   : > { %1845 = vst [vmem:[%s2606_s24 + $0x310] sm:$0xff] %v1405_v11 }
 0x2af   : > { %v1197_v14 = vpop.f32.mrb[72].mxu1  ;;  %1846 = vst.msk [vmem:[%s2606_s24 + $0x318] sm:$0xff] %vm1305_vm2, %v1406_v13 }
 0x2b0   : > { %v1514_v15 = vadd.f32 %v2760_v57, %v1197_v14  ;;  %v1199_v16 = vpop.f32.mrb[73].mxu1 }
 0x2b1   : > { %v1515_v17 = vadd.f32 %v2760_v57, %v1199_v16  ;;  %v1201_v18 = vpop.f32.mrb[74].mxu1  ;;  %v1044_v19 = vpop.f32.mrb[76].mxu0 }
 0x2b2   : > { %1896 = vst [vmem:[%s2606_s24 + $0x4a0] sm:$0xff] %v1514_v15  ;;  %v1516_v20 = vadd.f32 %v2760_v57, %v1201_v18  ;;  %v1203_v21 = vpop.f32.mrb[75].mxu1  ;;  %v1407_v22 = vadd.f32 %v2724_v25, %v1044_v19  ;;  %v1046_v23 = vpop.f32.mrb[77].mxu0 }
 0x2b3   : > { %1897 = vst.msk [vmem:[%s2606_s24 + $0x4a8] sm:$0xff] %vm1305_vm2, %v1515_v17  ;;  %v1517_v24 = vadd.f32 %v2760_v57, %v1203_v21  ;;  %v1408_v26 = vadd.f32 %v2724_v25, %v1046_v23  ;;  %v1048_v27 = vpop.f32.mrb[78].mxu0 }
 0x2b4   : > { %1898 = vst [vmem:[%s2606_s24 + $0x4b0] sm:$0xff] %v1516_v20  ;;  %1847 = vst [vmem:[%s2606_s24 + $0x320] sm:$0xff] %v1407_v22  ;;  %v1409_v28 = vadd.f32 %v2724_v25, %v1048_v27  ;;  %v1050_v29 = vpop.f32.mrb[79].mxu0 }
 0x2b5   : > { %1899 = vst.msk [vmem:[%s2606_s24 + $0x4b8] sm:$0xff] %vm1305_vm2, %v1517_v24  ;;  %1848 = vst.msk [vmem:[%s2606_s24 + $0x328] sm:$0xff] %vm1305_vm2, %v1408_v26  ;;  %v1410_v30 = vadd.f32 %v2724_v25, %v1050_v29 }
 0x2b6   : > { %1849 = vst [vmem:[%s2606_s24 + $0x330] sm:$0xff] %v1409_v28 }
 0x2b7   : > { %v1207_v31 = vpop.f32.mrb[76].mxu1  ;;  %1850 = vst.msk [vmem:[%s2606_s24 + $0x338] sm:$0xff] %vm1305_vm2, %v1410_v30 }
 0x2b8   : > { %v1518_v32 = vadd.f32 %v2760_v57, %v1207_v31  ;;  %v1209_v33 = vpop.f32.mrb[77].mxu1 }
 0x2b9   : > { %v1519_v34 = vadd.f32 %v2760_v57, %v1209_v33  ;;  %v1211_v35 = vpop.f32.mrb[78].mxu1  ;;  %v1054_v36 = vpop.f32.mrb[80].mxu0 }
 0x2ba   : > { %1900 = vst [vmem:[%s2606_s24 + $0x4c0] sm:$0xff] %v1518_v32  ;;  %v1520_v37 = vadd.f32 %v2760_v57, %v1211_v35  ;;  %v1213_v38 = vpop.f32.mrb[79].mxu1  ;;  %v1411_v39 = vadd.f32 %v2724_v25, %v1054_v36  ;;  %v1056_v40 = vpop.f32.mrb[81].mxu0 }
 0x2bb   : > { %1901 = vst.msk [vmem:[%s2606_s24 + $0x4c8] sm:$0xff] %vm1305_vm2, %v1519_v34  ;;  %v1521_v41 = vadd.f32 %v2760_v57, %v1213_v38  ;;  %v1412_v42 = vadd.f32 %v2724_v25, %v1056_v40  ;;  %v1058_v43 = vpop.f32.mrb[82].mxu0 }
 0x2bc   : > { %1902 = vst [vmem:[%s2606_s24 + $0x4d0] sm:$0xff] %v1520_v37  ;;  %1851 = vst [vmem:[%s2606_s24 + $0x340] sm:$0xff] %v1411_v39  ;;  %v1413_v44 = vadd.f32 %v2724_v25, %v1058_v43  ;;  %v1060_v45 = vpop.f32.mrb[83].mxu0 }
 0x2bd   : > { %1903 = vst.msk [vmem:[%s2606_s24 + $0x4d8] sm:$0xff] %vm1305_vm2, %v1521_v41  ;;  %1852 = vst.msk [vmem:[%s2606_s24 + $0x348] sm:$0xff] %vm1305_vm2, %v1412_v42  ;;  %v1414_v46 = vadd.f32 %v2724_v25, %v1060_v45 }
 0x2be   : > { %1853 = vst [vmem:[%s2606_s24 + $0x350] sm:$0xff] %v1413_v44 }
 0x2bf   : > { %v1217_v47 = vpop.f32.mrb[80].mxu1  ;;  %1854 = vst.msk [vmem:[%s2606_s24 + $0x358] sm:$0xff] %vm1305_vm2, %v1414_v46 }
 0x2c0   : > { %v1522_v48 = vadd.f32 %v2760_v57, %v1217_v47  ;;  %v1219_v49 = vpop.f32.mrb[81].mxu1 }
 0x2c1   : > { %v1523_v50 = vadd.f32 %v2760_v57, %v1219_v49  ;;  %v1221_v51 = vpop.f32.mrb[82].mxu1  ;;  %v1064_v52 = vpop.f32.mrb[84].mxu0 }
 0x2c2   : > { %1904 = vst [vmem:[%s2606_s24 + $0x4e0] sm:$0xff] %v1522_v48  ;;  %v1524_v53 = vadd.f32 %v2760_v57, %v1221_v51  ;;  %v1223_v55 = vpop.f32.mrb[83].mxu1  ;;  %v1415_v56 = vadd.f32 %v2724_v25, %v1064_v52  ;;  %v1066_v58 = vpop.f32.mrb[85].mxu0 }
 0x2c3   : > { %1905 = vst.msk [vmem:[%s2606_s24 + $0x4e8] sm:$0xff] %vm1305_vm2, %v1523_v50  ;;  %v1525_v54 = vadd.f32 %v2760_v57, %v1223_v55  ;;  %v1416_v59 = vadd.f32 %v2724_v25, %v1066_v58  ;;  %v1068_v60 = vpop.f32.mrb[86].mxu0 }
 0x2c4   : > { %1906 = vst [vmem:[%s2606_s24 + $0x4f0] sm:$0xff] %v1524_v53  ;;  %1855 = vst [vmem:[%s2606_s24 + $0x360] sm:$0xff] %v1415_v56  ;;  %v1417_v61 = vadd.f32 %v2724_v25, %v1068_v60  ;;  %v1070_v62 = vpop.f32.mrb[87].mxu0 }
 0x2c5   : > { %1907 = vst.msk [vmem:[%s2606_s24 + $0x4f8] sm:$0xff] %vm1305_vm2, %v1525_v54  ;;  %1856 = vst.msk [vmem:[%s2606_s24 + $0x368] sm:$0xff] %vm1305_vm2, %v1416_v59  ;;  %v1418_v63 = vadd.f32 %v2724_v25, %v1070_v62 }
 0x2c6   : > { %1857 = vst [vmem:[%s2606_s24 + $0x370] sm:$0xff] %v1417_v61 }
 0x2c7   : > { %v1227_v0 = vpop.f32.mrb[84].mxu1  ;;  %1858 = vst.msk [vmem:[%s2606_s24 + $0x378] sm:$0xff] %vm1305_vm2, %v1418_v63 }
 0x2c8   : > { %v1526_v1 = vadd.f32 %v2760_v57, %v1227_v0  ;;  %v1229_v2 = vpop.f32.mrb[85].mxu1 }
 0x2c9   : > { %v1527_v3 = vadd.f32 %v2760_v57, %v1229_v2  ;;  %v1231_v4 = vpop.f32.mrb[86].mxu1 }
 0x2ca   : > { %1908 = vst [vmem:[%s2606_s24 + $0x500] sm:$0xff] %v1526_v1  ;;  %v1528_v5 = vadd.f32 %v2760_v57, %v1231_v4  ;;  %v1233_v6 = vpop.f32.mrb[87].mxu1 }
 0x2cb   : > { %1909 = vst.msk [vmem:[%s2606_s24 + $0x508] sm:$0xff] %vm1305_vm2, %v1527_v3  ;;  %v1529_v25 = vadd.f32 %v2760_v57, %v1233_v6 }
 0x2cc   : > { %1910 = vst [vmem:[%s2606_s24 + $0x510] sm:$0xff] %v1528_v5 }
 0x2cd   : > { %1911 = vst.msk [vmem:[%s2606_s24 + $0x518] sm:$0xff] %vm1305_vm2, %v1529_v25 }
 0x2cf   : > { %v1237_v7 = vpop.f32.mrb[88].mxu1 }
 0x2d0   : > { %v1530_v8 = vadd.f32 %v2760_v57, %v1237_v7  ;;  %v1239_v9 = vpop.f32.mrb[89].mxu1 }
 0x2d1   : > { %v1531_v10 = vadd.f32 %v2760_v57, %v1239_v9  ;;  %v1241_v11 = vpop.f32.mrb[90].mxu1 }
 0x2d2   : > { %1912 = vst [vmem:[%s2606_s24 + $0x520] sm:$0xff] %v1530_v8  ;;  %v1532_v12 = vadd.f32 %v2760_v57, %v1241_v11  ;;  %v1243_v13 = vpop.f32.mrb[91].mxu1 }
 0x2d3   : > { %1913 = vst.msk [vmem:[%s2606_s24 + $0x528] sm:$0xff] %vm1305_vm2, %v1531_v10  ;;  %v1533_v14 = vadd.f32 %v2760_v57, %v1243_v13 }
 0x2d4   : > { %1914 = vst [vmem:[%s2606_s24 + $0x530] sm:$0xff] %v1532_v12 }
 0x2d5   : > { %1915 = vst.msk [vmem:[%s2606_s24 + $0x538] sm:$0xff] %vm1305_vm2, %v1533_v14 }
 0x2d6   : > { %2139 = shalt.err (!%p2136_p12)
}
 0x2d7   : > { %s2140_s12 = scalar_lea.hbm %s3027_s8, 21504  ;;  %s2144_s24 = scalar_lea.hbm %s3088_s4, 43008 }
 0x2d8   : > { %p2141_p5 = scmp.ne.s32.totalorder %s3027_s8, %s2140_s12  ;;  %p2145_p10 = scmp.lt.u32.totalorder %s3027_s8, %s3088_s4 }
 0x2d9   : > { %p2146_p2 = scmp.lt.u32.totalorder %s2144_s24, %s2140_s12  ;;  %p2148_p7 = scmp.lt.u32.totalorder %s2140_s12, %s3027_s8 }
 0x2da   : > { %p2142_p3 = pnand %p2141_p5, %p3103_p13 }
 0x2db   : > { %p2147_p4 = por %p2146_p2, %p2145_p10 }
 0x2dc   : > { %p2143_p6 = pneg %p2142_p3 }
 0x2dd   : > { %p2149_p11 = por %p2148_p7, %p2147_p4 }
 0x2df   : > { %p2150_p1 = pnand %p2149_p11, %p2143_p6 }
 0x2e1   : > { %2153 = shalt.err (!%p2150_p1)
}
 0x2e2   : > { %s2227_s29 = smov 256   ;;  %s2228_s14 = smov 16  }
 0x2e3   : > { %1934 = dma.vmem_to_hbm [thread:$0]  (%p3103_p13), %s3029_s13, 21504, %s3027_s8, %s1592_s18, %s2227_s29, %s2227_s29, %s2228_s14  }
 0x2e4 PF: > { %s1620_s22 = sand.u32 1, %s2196_s15   ;;  %p3104_p0 = scmp.ne.s32.totalorder %s3096_s27, 0 }
 0x2e5   : > { %p3105_p8 = scmp.ge.s32.totalorder %s2216_s20, 2  ;;  %s1621_s5 = scalar_lea.sflag [#allocation5], %s1620_s22 }
 0x2e7   : > { %p1948_p9 = pnand %p3105_p8, %p3104_p0 }
 0x2e9   : > { %2191 = dma.done.wait (!%p1948_p9), %s1621_s5, 21504  }
 0x2ea   : > { %2193 = vsyncadd (!%p1948_p9), %s1621_s5, 4294945792  ;;  %s22_s20 = sadd.s32 1, %s2216_s20   ;;  %s3106_s15 = smov %s2200_s16 }
 0x2eb   : > { %p19_p12 = scmp.ge.s32.totalorder %s22_s20, 4   ;;  %s3107_s16 = smov %s2204_s17 }
 0x2ec   : > { %s3108_s17 = smov %s2393_s21  ;;  %s3109_s18 = smov %s2212_s19 }
 0x2ed   : > { %s3110_s19 = smov %s3112_s7  ;;  %21 = sbr.rel (!%p19_p12) target bundleno = 8 (0x8), region = 101 }
 0x2f4   :  { %1626 = vsyncpa [#allocation4], 1 }
 0x2f5   :  { %1628 = vsyncpa [#allocation4 + $0x1], 1 }
 0x2f6   :  { %1629 = vsyncpa [#allocation9], 1 }
 0x2f7   :  { %1630 = vsyncpa [#allocation5], 1 }
 0x2f8   :  { %1632 = vsyncpa [#allocation5 + $0x1], 1 }
 0x2f9   :  { %1633 = vsyncpa [#allocation6], 1 }
 0x2fa   :  { %1635 = vsyncpa [#allocation6 + $0x1], 1 }

</bundles_post_ra>
